<compile_context>
chip_gen: v7x
topology: tpu7x:2x2x1
jax: 0.10.0
libtpu: 0.0.40
codegen_flags: <defaults>
</compile_context>

<pallas_src>
import numpy as np
import jax
import jax.numpy as jnp
from jax.experimental import pallas as pl
from jax.experimental.pallas import tpu as pltpu

LANE = 128  # per-term / per-gate-column feature padding (one full lane tile)


# --------------------------------------------------------------------------- kernel

def _dcgru_cell_kernel(x_ref, h_ref, s_ref, wx_ref, whru_ref, whc_ref,
                       bru_ref, bc_ref, o_ref):
    """One batch element per grid step.

    x_ref   : (N, P)      inputs, features padded to P=128 lanes
    h_ref   : (N, P)      hidden state, padded to P lanes
    s_ref   : (N, N)      dense support (scaled Laplacian), MXU dtype
    wx_ref  : (K*P, 3*P)  x-part weights, terms stacked on rows, [r|u|c] on columns
    whru_ref: (K*P, 2*P)  state-part weights for [r|u]
    whc_ref : (K*P, P)    state-part weights for c
    bru_ref : (1, 2*P)    [r|u] bias (f32)
    bc_ref  : (1, P)      c bias (f32)
    o_ref   : (N, P)      new hidden state (lane-dense, padded)
    """
    P = x_ref.shape[-1]
    K = wx_ref.shape[0] // P
    mxu_dtype = wx_ref.dtype

    s = s_ref[...]                                     # VMEM-resident across the grid
    h = h_ref[...].astype(jnp.float32)

    def cheb_stack(x0):
        # T_0..T_{K-1} of the Chebyshev recurrence, stacked along lanes (P-aligned) so
        # the gate matmuls contract over all K terms at once.  The carry stays f32;
        # only the MXU operands are cast to mxu_dtype.
        terms = [x0]
        if K > 1:
            x1 = jnp.dot(s, x0.astype(mxu_dtype), preferred_element_type=jnp.float32)
            terms.append(x1)
            xkm2, xkm1 = x0, x1
            for _ in range(2, K):
                xk = 2.0 * jnp.dot(s, xkm1.astype(mxu_dtype),
                                   preferred_element_type=jnp.float32) - xkm2
                terms.append(xk)
                xkm2, xkm1 = xkm1, xk
        return jnp.concatenate(terms, axis=-1).astype(mxu_dtype)    # (N, K*P)

    tx = cheb_stack(x_ref[...].astype(jnp.float32))                 # (N, K*P)
    th = cheb_stack(h)                                              # (N, K*P)

    # x-part contribution for all three gates in ONE wide matmul (shared by r, u, c).
    xc = jnp.dot(tx, wx_ref[...], preferred_element_type=jnp.float32)      # (N, 3*P)

    # reset / update gates: one stacked-K matmul, 256-lane output, 128-aligned slices.
    ru = jax.nn.sigmoid(
        xc[:, :2 * P]
        + jnp.dot(th, whru_ref[...], preferred_element_type=jnp.float32)
        + bru_ref[...])                                                     # (N, 2*P)
    r = ru[:, :P]
    u = ru[:, P:2 * P]

    # candidate gate: diffusion of r*h (padded lanes of r*h are exactly zero).
    trh = cheb_stack(r * h)
    c = jnp.tanh(
        xc[:, 2 * P:]
        + jnp.dot(trh, whc_ref[...], preferred_element_type=jnp.float32)
        + bc_ref[...])                                                      # (N, P)

    # GRU combine; lane-dense (P-wide) unmasked store.
    o_ref[...] = (u * h + (1.0 - u) * c).astype(o_ref.dtype)


# ------------------------------------------------------------------- pallas_call glue

def _dcgru_cell_pallas(x_pad, h_pad, support, wx, whru, whc, bru, bc):
    B, N, P = x_pad.shape
    KP = wx.shape[0]
    return pl.pallas_call(
        _dcgru_cell_kernel,
        out_shape=jax.ShapeDtypeStruct((B, N, P), jnp.float32),
        grid=(B,),
        in_specs=[
            pl.BlockSpec((None, N, P), lambda b: (b, 0, 0)),   # x   (per-batch tile)
            pl.BlockSpec((None, N, P), lambda b: (b, 0, 0)),   # h   (per-batch tile)
            pl.BlockSpec((N, N), lambda b: (0, 0)),            # support   (resident)
            pl.BlockSpec((KP, 3 * P), lambda b: (0, 0)),       # wx  [r|u|c](resident)
            pl.BlockSpec((KP, 2 * P), lambda b: (0, 0)),       # wh_ru      (resident)
            pl.BlockSpec((KP, P), lambda b: (0, 0)),           # wh_c       (resident)
            pl.BlockSpec((1, 2 * P), lambda b: (0, 0)),        # b_ru
            pl.BlockSpec((1, P), lambda b: (0, 0)),            # b_c
        ],
        out_specs=pl.BlockSpec((None, N, P), lambda b: (b, 0, 0)),
        compiler_params=pltpu.CompilerParams(
            dimension_semantics=("parallel",),      # shard batches over v7x's 2 TCs
            vmem_limit_bytes=48 * 1024 * 1024,      # headroom under v7x's 64 MiB VMEM
        ),
    )(x_pad, h_pad, support, wx, whru, whc, bru, bc)


def dcgru_cell_forward(params, inputs, hx, num_nodes, input_dim, num_units,
                       mxu_dtype=jnp.float32):
    """inputs: (B, num_nodes*input_dim), hx: (B, num_nodes*num_units)
       returns (B, num_nodes*num_units).

       mxu_dtype=jnp.bfloat16 halves weight/term bytes and uses the fast MXU path on
       v5e/v6e/v7x; all elementwise / gate math stays f32 inside the kernel."""
    B = inputs.shape[0]
    P = LANE
    x3 = inputs.reshape(B, num_nodes, input_dim)
    h3 = hx.reshape(B, num_nodes, num_units)
    x_pad = jnp.zeros((B, num_nodes, P), jnp.float32).at[..., :input_dim].set(x3)
    h_pad = jnp.zeros((B, num_nodes, P), jnp.float32).at[..., :num_units].set(h3)
    out = _dcgru_cell_pallas(
        x_pad, h_pad,
        params["support"].astype(mxu_dtype),
        params["wx_packed"].astype(mxu_dtype),
        params["whru_packed"].astype(mxu_dtype),
        params["whc_packed"].astype(mxu_dtype),
        params["b_ru_packed"], params["b_c_packed"])
    # TODO(synk): when driving a scanned DCRNN, keep the state in the padded (B,N,128)
    # layout across steps and alias hx -> out via input_output_aliases instead of the
    # per-step pad / slice round trip.
    return out[..., :num_units].reshape(B, num_nodes * num_units)


# ------------------------------------------------------------------- parameter setup

def _calculate_scaled_laplacian(adj_mx):
    """Matches libcity calculate_scaled_laplacian(adj, lambda_max=None), dense."""
    adj = np.maximum(adj_mx, adj_mx.T)
    d = adj.sum(axis=1)
    d_safe = np.where(d > 0.0, d, 1.0)
    d_inv_sqrt = np.where(d > 0.0, d_safe ** -0.5, 0.0)     # no uninitialized values
    n = adj.shape[0]
    lap = np.eye(n) - (d_inv_sqrt[:, None] * adj) * d_inv_sqrt[None, :]
    lambda_max = float(np.max(np.abs(np.linalg.eigvalsh(lap))))
    return ((2.0 / lambda_max) * lap - np.eye(n)).astype(np.float32)


def init_dcgru_params(key, adj_mx, input_dim, num_units, max_diffusion_step):
    """Synthetic parameters mirroring DCGRUCell.__init__
    (filter_type='laplacian' -> 1 support, use_gc_for_ru=True, nonlinearity='tanh')."""
    support = _calculate_scaled_laplacian(adj_mx)
    K = max_diffusion_step + 1                               # num_matrices
    F = input_dim + num_units
    U = num_units
    P = LANE

    def xavier_normal(k, fan_in, fan_out):
        std = np.sqrt(2.0 / (fan_in + fan_out)).astype(np.float32)
        return jax.random.normal(k, (fan_in, fan_out), jnp.float32) * std

    k_ru, k_c = jax.random.split(key)
    # torch GCONV weight layout: row index = f * K + k, f over concat(input, state)
    w_ru_flat = xavier_normal(k_ru, F * K, 2 * U)
    w_c_flat = xavier_normal(k_c, F * K, U)
    b_ru_flat = jnp.full((2 * U,), 1.0, jnp.float32)         # bias_start = 1.0
    b_c_flat = jnp.zeros((U,), jnp.float32)                  # bias_start = 0.0

    # (feature, term, out) views of the torch row layout
    w_ru = w_ru_flat.reshape(F, K, 2 * U)
    w_c = w_c_flat.reshape(F, K, U)

    # ---- merged + padded kernel weights -------------------------------------------
    # rows:  k*P + f_local   (Chebyshev terms stacked along the contraction axis)
    # cols:  [ r | u | c ] for wx, [ r | u ] for wh_ru, [ c ] for wh_c, each P wide
    wx = jnp.zeros((K, P, 3 * P), jnp.float32)
    wx = wx.at[:, :input_dim, 0:U].set(jnp.transpose(w_ru[:input_dim, :, :U], (1, 0, 2)))
    wx = wx.at[:, :input_dim, P:P + U].set(jnp.transpose(w_ru[:input_dim, :, U:], (1, 0, 2)))
    wx = wx.at[:, :input_dim, 2 * P:2 * P + U].set(jnp.transpose(w_c[:input_dim, :, :], (1, 0, 2)))

    whru = jnp.zeros((K, P, 2 * P), jnp.float32)
    whru = whru.at[:, :U, 0:U].set(jnp.transpose(w_ru[input_dim:, :, :U], (1, 0, 2)))
    whru = whru.at[:, :U, P:P + U].set(jnp.transpose(w_ru[input_dim:, :, U:], (1, 0, 2)))

    whc = jnp.zeros((K, P, P), jnp.float32)
    whc = whc.at[:, :U, 0:U].set(jnp.transpose(w_c[input_dim:, :, :], (1, 0, 2)))

    b_ru_packed = jnp.zeros((1, 2 * P), jnp.float32)
    b_ru_packed = b_ru_packed.at[0, 0:U].set(b_ru_flat[:U]).at[0, P:P + U].set(b_ru_flat[U:])
    b_c_packed = jnp.zeros((1, P), jnp.float32).at[0, 0:U].set(b_c_flat)

    return dict(
        support=jnp.asarray(support),
        wx_packed=wx.reshape(K * P, 3 * P),
        whru_packed=whru.reshape(K * P, 2 * P),
        whc_packed=whc.reshape(K * P, P),
        b_ru_packed=b_ru_packed,
        b_c_packed=b_c_packed,
        # flat torch-layout copies for the pure-JAX reference
        w_ru_flat=w_ru_flat, w_c_flat=w_c_flat, b_ru_flat=b_ru_flat, b_c_flat=b_c_flat,
    )


# --------------------------------------------------------------- plain-JAX reference

def _gconv_ref(x, state, support, w_flat, bias, max_diffusion_step):
    hi = jax.lax.Precision.HIGHEST
    B, N, _ = x.shape
    xs = jnp.concatenate([x, state], axis=-1)
    F = xs.shape[-1]
    x0 = xs.transpose(1, 2, 0).reshape(N, F * B)
    mats = [x0]
    if max_diffusion_step > 0:
        x1 = jnp.dot(support, x0, precision=hi)
        mats.append(x1)
        for _ in range(2, max_diffusion_step + 1):
            x2 = 2.0 * jnp.dot(support, x1, precision=hi) - x0
            mats.append(x2)
            x1, x0 = x2, x1
    num_m = len(mats)
    stacked = jnp.stack(mats, 0).reshape(num_m, N, F, B).transpose(3, 1, 2, 0)
    flat = stacked.reshape(B * N, F * num_m)
    out = jnp.dot(flat, w_flat, precision=hi) + bias
    return out.reshape(B, N, -1)


def dcgru_ref(params, inputs, hx, num_nodes, input_dim, num_units, max_diffusion_step):
    B = inputs.shape[0]
    x = inputs.reshape(B, num_nodes, input_dim)
    h = hx.reshape(B, num_nodes, num_units)
    value = jax.nn.sigmoid(
        _gconv_ref(x, h, params["support"], params["w_ru_flat"], params["b_ru_flat"],
                   max_diffusion_step))
    r = value[..., :num_units]
    u = value[..., num_units:]
    c = jnp.tanh(
        _gconv_ref(x, r * h, params["support"], params["w_c_flat"], params["b_c_flat"],
                   max_diffusion_step))
    new_h = u * h + (1.0 - u) * c
    return new_h.reshape(B, num_nodes * num_units)


# ------------------------------------------------------------------------------ main

if __name__ == "__main__":
    B, N, INPUT_DIM, NUM_UNITS, MAX_DIFF = 2, 16, 2, 8, 2

    key = jax.random.PRNGKey(0)
    k_adj, k_w, k_x, k_h = jax.random.split(key, 4)

    # writable numpy copy; zero the diagonal without an in-place op on a jax buffer
    adj = np.array(jax.random.uniform(k_adj, (N, N), jnp.float32))
    adj = adj * (1.0 - np.eye(N, dtype=np.float32))

    params = init_dcgru_params(k_w, adj, INPUT_DIM, NUM_UNITS, MAX_DIFF)

    inputs = jax.random.normal(k_x, (B, N * INPUT_DIM), jnp.float32)
    hx = jax.random.normal(k_h, (B, N * NUM_UNITS), jnp.float32)

    ref = dcgru_ref(params, inputs, hx, N, INPUT_DIM, NUM_UNITS, MAX_DIFF)

    # f32 MXU operands: tight correctness check.
    out_f32 = dcgru_cell_forward(params, inputs, hx, N, INPUT_DIM, NUM_UNITS,
                                 mxu_dtype=jnp.float32)
    out_f32 = jax.block_until_ready(out_f32)
    np.testing.assert_allclose(np.asarray(out_f32), np.asarray(ref), rtol=2e-3, atol=2e-3)

    # bf16 MXU operands (production path per perf review): f32 Chebyshev carry and gate
    # math, looser tolerance to account for bf16 operand rounding.
    out_bf16 = dcgru_cell_forward(params, inputs, hx, N, INPUT_DIM, NUM_UNITS,
                                  mxu_dtype=jnp.bfloat16)
    out_bf16 = jax.block_until_ready(out_bf16)
    np.testing.assert_allclose(np.asarray(out_bf16), np.asarray(ref), rtol=5e-2, atol=5e-2)

    print("KERNEL_OK")
</pallas_src>

<mosaic_0001>
module attributes {stable_mosaic.version = 11 : i64} {
  func.func @_dcgru_cell_kernel(%arg0: i32, %arg1: memref<1x16x128xf32, #tpu.memory_space<vmem>>, %arg2: memref<1x16x128xf32, #tpu.memory_space<vmem>>, %arg3: memref<16x16xf32, #tpu.memory_space<vmem>>, %arg4: memref<384x384xf32, #tpu.memory_space<vmem>>, %arg5: memref<384x256xf32, #tpu.memory_space<vmem>>, %arg6: memref<384x128xf32, #tpu.memory_space<vmem>>, %arg7: memref<1x256xf32, #tpu.memory_space<vmem>>, %arg8: memref<1x128xf32, #tpu.memory_space<vmem>>, %arg9: memref<1x16x128xf32, #tpu.memory_space<vmem>>) attributes {dimension_semantics = [#tpu.dimension_semantics<parallel>], iteration_bounds = array<i64: 2>, scalar_prefetch = 0 : i64, scratch_operands = 0 : i64, tpu.core_type = #tpu.core_type<tc>, window_params = [{transform_indices = @transform_0, window_bounds = array<i64: 1, 16, 128>}, {transform_indices = @transform_1, window_bounds = array<i64: 1, 16, 128>}, {pipeline_mode = #tpu.pipeline_mode<synchronous>, transform_indices = @transform_2, window_bounds = array<i64: 16, 16>}, {pipeline_mode = #tpu.pipeline_mode<synchronous>, transform_indices = @transform_3, window_bounds = array<i64: 384, 384>}, {pipeline_mode = #tpu.pipeline_mode<synchronous>, transform_indices = @transform_4, window_bounds = array<i64: 384, 256>}, {pipeline_mode = #tpu.pipeline_mode<synchronous>, transform_indices = @transform_5, window_bounds = array<i64: 384, 128>}, {pipeline_mode = #tpu.pipeline_mode<synchronous>, transform_indices = @transform_6, window_bounds = array<i64: 1, 256>}, {pipeline_mode = #tpu.pipeline_mode<synchronous>, transform_indices = @transform_7, window_bounds = array<i64: 1, 128>}, {transform_indices = @transform_8, window_bounds = array<i64: 1, 16, 128>}]} {
    %c0 = arith.constant 0 : index
    %c0_0 = arith.constant 0 : index
    %0 = vector.load %arg3[%c0, %c0_0] : memref<16x16xf32, #tpu.memory_space<vmem>>, vector<16x16xf32>
    %c0_1 = arith.constant 0 : index
    %c0_2 = arith.constant 0 : index
    %c0_3 = arith.constant 0 : index
    %1 = vector.load %arg2[%c0_1, %c0_2, %c0_3] : memref<1x16x128xf32, #tpu.memory_space<vmem>>, vector<1x16x128xf32>
    %2 = vector.shape_cast %1 : vector<1x16x128xf32> to vector<16x128xf32>
    %c0_4 = arith.constant 0 : index
    %c0_5 = arith.constant 0 : index
    %c0_6 = arith.constant 0 : index
    %3 = vector.load %arg1[%c0_4, %c0_5, %c0_6] : memref<1x16x128xf32, #tpu.memory_space<vmem>>, vector<1x16x128xf32>
    %4 = vector.shape_cast %3 : vector<1x16x128xf32> to vector<16x128xf32>
    %cst = arith.constant dense<0.000000e+00> : vector<16x128xf32>
    %5 = tpu.matmul %0, %4, %cst {dimension_numbers = #tpu.dot_dimension_numbers<[1], [0], [0], [1], [0, 0, 1, 1], [], []>} : vector<16x16xf32>, vector<16x128xf32>, vector<16x128xf32> -> vector<16x128xf32>
    %cst_7 = arith.constant dense<0.000000e+00> : vector<16x128xf32>
    %6 = tpu.matmul %0, %5, %cst_7 {dimension_numbers = #tpu.dot_dimension_numbers<[1], [0], [0], [1], [0, 0, 1, 1], [], []>} : vector<16x16xf32>, vector<16x128xf32>, vector<16x128xf32> -> vector<16x128xf32>
    %cst_8 = arith.constant 2.000000e+00 : f32
    %7 = vector.broadcast %cst_8 : f32 to vector<16x128xf32>
    %8 = arith.mulf %7, %6 : vector<16x128xf32>
    %9 = arith.subf %8, %4 : vector<16x128xf32>
    %10 = tpu.concatenate %4, %5, %9 in 1 : vector<16x128xf32>, vector<16x128xf32>, vector<16x128xf32> -> vector<16x384xf32>
    %cst_9 = arith.constant dense<0.000000e+00> : vector<16x128xf32>
    %11 = tpu.matmul %0, %2, %cst_9 {dimension_numbers = #tpu.dot_dimension_numbers<[1], [0], [0], [1], [0, 0, 1, 1], [], []>} : vector<16x16xf32>, vector<16x128xf32>, vector<16x128xf32> -> vector<16x128xf32>
    %cst_10 = arith.constant dense<0.000000e+00> : vector<16x128xf32>
    %12 = tpu.matmul %0, %11, %cst_10 {dimension_numbers = #tpu.dot_dimension_numbers<[1], [0], [0], [1], [0, 0, 1, 1], [], []>} : vector<16x16xf32>, vector<16x128xf32>, vector<16x128xf32> -> vector<16x128xf32>
    %cst_11 = arith.constant 2.000000e+00 : f32
    %13 = vector.broadcast %cst_11 : f32 to vector<16x128xf32>
    %14 = arith.mulf %13, %12 : vector<16x128xf32>
    %15 = arith.subf %14, %2 : vector<16x128xf32>
    %16 = tpu.concatenate %2, %11, %15 in 1 : vector<16x128xf32>, vector<16x128xf32>, vector<16x128xf32> -> vector<16x384xf32>
    %c0_12 = arith.constant 0 : index
    %c0_13 = arith.constant 0 : index
    %17 = vector.load %arg4[%c0_12, %c0_13] : memref<384x384xf32, #tpu.memory_space<vmem>>, vector<384x384xf32>
    %cst_14 = arith.constant dense<0.000000e+00> : vector<16x384xf32>
    %18 = tpu.matmul %10, %17, %cst_14 {dimension_numbers = #tpu.dot_dimension_numbers<[1], [0], [0], [1], [0, 0, 1, 1], [], []>} : vector<16x384xf32>, vector<384x384xf32>, vector<16x384xf32> -> vector<16x384xf32>
    %19 = vector.extract_strided_slice %18 {offsets = [0, 0], sizes = [16, 256], strides = [1, 1]} : vector<16x384xf32> to vector<16x256xf32>
    %c0_15 = arith.constant 0 : index
    %c0_16 = arith.constant 0 : index
    %20 = vector.load %arg5[%c0_15, %c0_16] : memref<384x256xf32, #tpu.memory_space<vmem>>, vector<384x256xf32>
    %cst_17 = arith.constant dense<0.000000e+00> : vector<16x256xf32>
    %21 = tpu.matmul %16, %20, %cst_17 {dimension_numbers = #tpu.dot_dimension_numbers<[1], [0], [0], [1], [0, 0, 1, 1], [], []>} : vector<16x384xf32>, vector<384x256xf32>, vector<16x256xf32> -> vector<16x256xf32>
    %22 = arith.addf %19, %21 : vector<16x256xf32>
    %c0_18 = arith.constant 0 : index
    %c0_19 = arith.constant 0 : index
    %23 = vector.load %arg7[%c0_18, %c0_19] : memref<1x256xf32, #tpu.memory_space<vmem>>, vector<1x256xf32>
    %24 = vector.broadcast %23 : vector<1x256xf32> to vector<16x256xf32>
    %25 = arith.addf %22, %24 : vector<16x256xf32>
    %26 = arith.negf %25 : vector<16x256xf32>
    %27 = math.exp %26 : vector<16x256xf32>
    %cst_20 = arith.constant 1.000000e+00 : f32
    %28 = vector.broadcast %cst_20 : f32 to vector<16x256xf32>
    %29 = arith.addf %28, %27 : vector<16x256xf32>
    %30 = arith.divf %28, %29 : vector<16x256xf32>
    %31 = vector.extract_strided_slice %30 {offsets = [0, 0], sizes = [16, 128], strides = [1, 1]} : vector<16x256xf32> to vector<16x128xf32>
    %32 = vector.extract_strided_slice %30 {offsets = [0, 128], sizes = [16, 128], strides = [1, 1]} : vector<16x256xf32> to vector<16x128xf32>
    %33 = arith.mulf %31, %2 : vector<16x128xf32>
    %cst_21 = arith.constant dense<0.000000e+00> : vector<16x128xf32>
    %34 = tpu.matmul %0, %33, %cst_21 {dimension_numbers = #tpu.dot_dimension_numbers<[1], [0], [0], [1], [0, 0, 1, 1], [], []>} : vector<16x16xf32>, vector<16x128xf32>, vector<16x128xf32> -> vector<16x128xf32>
    %cst_22 = arith.constant dense<0.000000e+00> : vector<16x128xf32>
    %35 = tpu.matmul %0, %34, %cst_22 {dimension_numbers = #tpu.dot_dimension_numbers<[1], [0], [0], [1], [0, 0, 1, 1], [], []>} : vector<16x16xf32>, vector<16x128xf32>, vector<16x128xf32> -> vector<16x128xf32>
    %cst_23 = arith.constant 2.000000e+00 : f32
    %36 = vector.broadcast %cst_23 : f32 to vector<16x128xf32>
    %37 = arith.mulf %36, %35 : vector<16x128xf32>
    %38 = arith.subf %37, %33 : vector<16x128xf32>
    %39 = tpu.concatenate %33, %34, %38 in 1 : vector<16x128xf32>, vector<16x128xf32>, vector<16x128xf32> -> vector<16x384xf32>
    %40 = vector.extract_strided_slice %18 {offsets = [0, 256], sizes = [16, 128], strides = [1, 1]} : vector<16x384xf32> to vector<16x128xf32>
    %c0_24 = arith.constant 0 : index
    %c0_25 = arith.constant 0 : index
    %41 = vector.load %arg6[%c0_24, %c0_25] : memref<384x128xf32, #tpu.memory_space<vmem>>, vector<384x128xf32>
    %cst_26 = arith.constant dense<0.000000e+00> : vector<16x128xf32>
    %42 = tpu.matmul %39, %41, %cst_26 {dimension_numbers = #tpu.dot_dimension_numbers<[1], [0], [0], [1], [0, 0, 1, 1], [], []>} : vector<16x384xf32>, vector<384x128xf32>, vector<16x128xf32> -> vector<16x128xf32>
    %43 = arith.addf %40, %42 : vector<16x128xf32>
    %c0_27 = arith.constant 0 : index
    %c0_28 = arith.constant 0 : index
    %44 = vector.load %arg8[%c0_27, %c0_28] : memref<1x128xf32, #tpu.memory_space<vmem>>, vector<1x128xf32>
    %45 = vector.broadcast %44 : vector<1x128xf32> to vector<16x128xf32>
    %46 = arith.addf %43, %45 : vector<16x128xf32>
    %47 = math.tanh %46 : vector<16x128xf32>
    %48 = arith.mulf %32, %2 : vector<16x128xf32>
    %cst_29 = arith.constant 1.000000e+00 : f32
    %49 = vector.broadcast %cst_29 : f32 to vector<16x128xf32>
    %50 = arith.subf %49, %32 : vector<16x128xf32>
    %51 = arith.mulf %50, %47 : vector<16x128xf32>
    %52 = arith.addf %48, %51 : vector<16x128xf32>
    %c0_30 = arith.constant 0 : index
    %c0_31 = arith.constant 0 : index
    %c0_32 = arith.constant 0 : index
    %53 = vector.load %arg9[%c0_30, %c0_31, %c0_32] : memref<1x16x128xf32, #tpu.memory_space<vmem>>, vector<1x16x128xf32>
    %54 = vector.shape_cast %53 : vector<1x16x128xf32> to vector<16x128xf32>
    %55 = vector.shape_cast %52 : vector<16x128xf32> to vector<1x16x128xf32>
    tpu.vector_store %arg9[%c0_30, %c0_31, %c0_32], %55 {strides = array<i32>} : memref<1x16x128xf32, #tpu.memory_space<vmem>>, vector<1x16x128xf32>,
    return
  }
  func.func @transform_0(%arg0: i32) -> (i32, i32, i32) {
    %c0_i32 = arith.constant 0 : i32
    %c0_i32_0 = arith.constant 0 : i32
    %c0_i32_1 = arith.constant 0 : i32
    return %arg0, %c0_i32, %c0_i32_0 : i32, i32, i32
  }
  func.func @transform_1(%arg0: i32) -> (i32, i32, i32) {
    %c0_i32 = arith.constant 0 : i32
    %c0_i32_0 = arith.constant 0 : i32
    %c0_i32_1 = arith.constant 0 : i32
    return %arg0, %c0_i32, %c0_i32_0 : i32, i32, i32
  }
  func.func @transform_2(%arg0: i32) -> (i32, i32) {
    %c0_i32 = arith.constant 0 : i32
    %c0_i32_0 = arith.constant 0 : i32
    %c0_i32_1 = arith.constant 0 : i32
    return %c0_i32, %c0_i32_0 : i32, i32
  }
  func.func @transform_3(%arg0: i32) -> (i32, i32) {
    %c0_i32 = arith.constant 0 : i32
    %c0_i32_0 = arith.constant 0 : i32
    %c0_i32_1 = arith.constant 0 : i32
    return %c0_i32, %c0_i32_0 : i32, i32
  }
  func.func @transform_4(%arg0: i32) -> (i32, i32) {
    %c0_i32 = arith.constant 0 : i32
    %c0_i32_0 = arith.constant 0 : i32
    %c0_i32_1 = arith.constant 0 : i32
    return %c0_i32, %c0_i32_0 : i32, i32
  }
  func.func @transform_5(%arg0: i32) -> (i32, i32) {
    %c0_i32 = arith.constant 0 : i32
    %c0_i32_0 = arith.constant 0 : i32
    %c0_i32_1 = arith.constant 0 : i32
    return %c0_i32, %c0_i32_0 : i32, i32
  }
  func.func @transform_6(%arg0: i32) -> (i32, i32) {
    %c0_i32 = arith.constant 0 : i32
    %c0_i32_0 = arith.constant 0 : i32
    %c0_i32_1 = arith.constant 0 : i32
    return %c0_i32, %c0_i32_0 : i32, i32
  }
  func.func @transform_7(%arg0: i32) -> (i32, i32) {
    %c0_i32 = arith.constant 0 : i32
    %c0_i32_0 = arith.constant 0 : i32
    %c0_i32_1 = arith.constant 0 : i32
    return %c0_i32, %c0_i32_0 : i32, i32
  }
  func.func @transform_8(%arg0: i32) -> (i32, i32, i32) {
    %c0_i32 = arith.constant 0 : i32
    %c0_i32_0 = arith.constant 0 : i32
    %c0_i32_1 = arith.constant 0 : i32
    return %arg0, %c0_i32, %c0_i32_0 : i32, i32, i32
  }
}

</mosaic_0001>

<bundles_post_ra>
// kernel: tpu_custom_call.1
= control target key start
LH: loop header
LB: loop body
LE: loop exit
PB: predicated region body
PF: predicated region fallthrough
CT: control target
= control target key end

     0   :  { %s3577_s0 = inlined_call_operand.hbm [shape: f32[2,16,128], index: 0, kind: input, shape index: {}]   ;;  %s3578_s1 = inlined_call_operand.hbm [shape: f32[2,16,128], index: 1, kind: input, shape index: {}]   ;;  %s3579_s2 = inlined_call_operand.hbm [shape: f32[16,16], index: 2, kind: input, shape index: {}]   ;;  %s3580_s3 = inlined_call_operand.hbm [shape: f32[384,384], index: 3, kind: input, shape index: {}]   ;;  %s3581_s4 = inlined_call_operand.hbm [shape: f32[384,256], index: 4, kind: input, shape index: {}]   ;;  %s3582_s5 = inlined_call_operand.hbm [shape: f32[384,128], index: 5, kind: input, shape index: {}]   ;;  %s3583_s6 = inlined_call_operand.vmem [shape: f32[1,256], index: 6, kind: input, shape index: {}]   ;;  %s3584_s7 = inlined_call_operand.vmem [shape: f32[1,128], index: 7, kind: input, shape index: {}]   ;;  %s3585_s8 = inlined_call_operand.hbm [shape: f32[2,16,128], index: 8, kind: output, shape index: {}]  }
   0x1   :  { %3594 = sst [smem:[#allocation22_spill]] %s3579_s2 }
   0x2   :  { %3595 = sst [smem:[#allocation23_spill]] %s3580_s3 }
   0x3   :  { %3596 = sst [smem:[#allocation24_spill]] %s3581_s4 }
   0x4   :  { %3597 = sst [smem:[#allocation25_spill]] %s3582_s5 }
   0x5   :  { %13 = vsyncpa [#allocation3], 0 }
   0x6   :  { %15 = vsyncpa [#allocation3 + $0x1], 0 }
   0x7   :  { %16 = vsyncpa [#allocation6], 0 }
   0x8   :  { %18 = vsyncpa [#allocation6 + $0x1], 0 }
   0x9   :  { %19 = vsyncpa [#allocation9], 0 }
   0xa   :  { %20 = vsyncpa [#allocation12], 0 }
   0xb   :  { %21 = vsyncpa [#allocation4], 0 }
   0xc   :  { %23 = vsyncpa [#allocation4 + $0x1], 0  ;;  %s3110_s27 = smov 0   ;;  %s3112_s28 = smov 0  }
   0xd   :  { %s3114_s29 = smov 0   ;;  %s3116_s30 = smov 0  }
   0xe LB: > { %s3131_s9 = sadd.s32 4294967295, %s3047_s30   ;;  %s2010_s10 = sadd.s32 4294967294, %s3047_s30   ;;  %s3047_s30 = sphi %s3116_s30, %s3629_s30   ;;  %s3043_s29 = sphi %s3114_s29, %s3628_s29   ;;  %s3039_s28 = sphi %s3112_s28, %s3627_s28   ;;  %s3035_s27 = sphi %s3110_s27, %s3626_s27  }
   0xf   : > { %p49_p0 = scmp.ne.s32.totalorder %s3039_s28, %s3035_s27  ;;  %p3586_p1 = scmp.eq.s32.totalorder %s3131_s9, 0 }
  0x10   : > { %p231_p3 = scmp.eq.s32.totalorder %s2010_s10, 1  ;;  %p2011_p5 = scmp.ge.s32.totalorder %s3047_s30, 1 }
  0x11   : > { %p3140_p4 = por %p3586_p1, %p49_p0  ;;  %p238_p7 = scmp.lt.s32.totalorder %s3047_s30, 3 }
  0x12   : > { %p3145_p6 = por %p231_p3, %p49_p0  ;;  %s3049_s14 = smov [#allocation7]  }
  0x13   : > { %s3598_s11 = scalar_select %p3140_p4, 1, 0 }
  0x14   : > { %s3599_s12 = scalar_select %p3145_p6, 1, 0 }
  0x15   : > { %p3150_p8 = pnand %p2011_p5, %p238_p7  ;;  %s250_s15 = sshll.u32 %s3049_s14, 4  ;;  %s3154_s15 = int_to_ptr.vmem [resolvable:$true] %s250_s15 }
  0x16   : > { %3600 = sst [smem:[#allocation20_spill]] %s3599_s12  ;;  %s3050_s17 = smov [#allocation8]  }
  0x17   : > { %s3601_s13 = scalar_select %p3150_p8, 1, 0 }
  0x18   : > { %p2688_p9 = pneg %p3150_p8  ;;  %s263_s18 = sshll.u32 %s3050_s17, 4  ;;  %s3165_s18 = int_to_ptr.vmem [resolvable:$true] %s263_s18 }
  0x19   : > { %s3603_s2 = sld [smem:[#allocation22_spill]] }
  0x1a   : > { %p3161_p11 = pnand %p2688_p9, %p3586_p1 }
  0x1c   : > { %p3175_p13 = pneg %p3161_p11 }
  0x1f   : > { %s2793_s21 = scalar_lea.hbm %s3603_s2, 256 }
  0x20   : > { %p2794_p12 = scmp.ne.s32.totalorder %s3603_s2, %s2793_s21  ;;  %p2800_p5 = scmp.lt.u32.totalorder %s2793_s21, %s3603_s2 }
  0x22   : > { %p2796_p0 = pnand %p3175_p13, %p2794_p12 }
  0x24   : > { %p2797_p3 = pneg %p2796_p0 }
  0x26   : > { %p2802_p7 = pnand %p2800_p5, %p2797_p3 }
  0x28   : > { %2805 = shalt.err (!%p2802_p7)
}
  0x29   : > { %s2806_s10 = scalar_lea.vmem %s3154_s15, 256  ;;  %p2814_p2 = scmp.lt.s32.totalorder %s3154_s15, %s3154_s15 }
  0x2a   : > { %p2807_p9 = scmp.ne.s32.totalorder %s3154_s15, %s2806_s10  ;;  %p2815_p6 = scmp.lt.s32.totalorder %s2806_s10, %s2806_s10 }
  0x2c   : > { %p2809_p10 = pnand %p2807_p9, %p3175_p13  ;;  %p2816_p12 = por %p2815_p6, %p2814_p2 }
  0x2e   : > { %p2810_p1 = pneg %p2809_p10 }
  0x30   : > { %p2817_p0 = pnand %p2816_p12, %p2810_p1 }
  0x32   : > { %2820 = shalt.err (!%p2817_p0)
}
  0x33   : > { %s3588_s14 = smov 128   ;;  %s3590_s17 = smov 8  }
  0x34   : > { %2691 = dma.hbm_to_vmem [thread:$0]  (!%p3161_p11), %s3603_s2, 256, %s3154_s15, [#allocation6], %s3588_s14, %s3588_s14, %s3590_s17  }
  0x35   : > { %s3605_s3 = sld [smem:[#allocation23_spill]] }
  0x3b   : > { %s2821_s23 = scalar_lea.hbm %s3605_s3, 18432 }
  0x3c   : > { %p2822_p1 = scmp.ne.s32.totalorder %s3605_s3, %s2821_s23  ;;  %p2828_p10 = scmp.lt.u32.totalorder %s2821_s23, %s3605_s3 }
  0x3e   : > { %p2824_p2 = pnand %p2822_p1, %p3175_p13 }
  0x40   : > { %p2825_p6 = pneg %p2824_p2 }
  0x42   : > { %p2830_p3 = pnand %p2828_p10, %p2825_p6 }
  0x44   : > { %2833 = shalt.err (!%p2830_p3)
}
  0x45   : > { %s2834_s15 = scalar_lea.vmem %s3165_s18, 18432  ;;  %p2842_p12 = scmp.lt.s32.totalorder %s3165_s18, %s3165_s18 }
  0x46   : > { %p2835_p5 = scmp.ne.s32.totalorder %s3165_s18, %s2834_s15  ;;  %p2843_p0 = scmp.lt.s32.totalorder %s2834_s15, %s2834_s15 }
  0x48   : > { %p2837_p7 = pnand %p2835_p5, %p3175_p13  ;;  %p2844_p1 = por %p2843_p0, %p2842_p12 }
  0x4a   : > { %p2838_p9 = pneg %p2837_p7 }
  0x4c   : > { %p2845_p2 = pnand %p2844_p1, %p2838_p9 }
  0x4e   : > { %2848 = shalt.err (!%p2845_p2)
}
  0x4f   : > { %s3053_s19 = smov 384   ;;  %s3054_s12 = smov 24  }
  0x50   : > { %2694 = dma.hbm_to_vmem [thread:$0]  (!%p3161_p11), %s3605_s3, 18432, %s3165_s18, [#allocation9], %s3053_s19, %s3053_s19, %s3054_s12  }
  0x51   : > { %s3055_s22 = smov [#allocation10]   ;;  %s3606_s4 = sld [smem:[#allocation24_spill]] }
  0x52   : > { %s276_s23 = sshll.u32 %s3055_s22, 4  ;;  %s277_s23 = int_to_ptr.vmem [resolvable:$true] %s276_s23 }
  0x57   : > { %s2849_s10 = scalar_lea.hbm %s3606_s4, 12288 }
  0x58   : > { %p2850_p6 = scmp.ne.s32.totalorder %s3606_s4, %s2849_s10  ;;  %p2856_p5 = scmp.lt.u32.totalorder %s2849_s10, %s3606_s4 }
  0x5a   : > { %p2852_p10 = pnand %p2850_p6, %p3175_p13 }
  0x5c   : > { %p2853_p3 = pneg %p2852_p10 }
  0x5e   : > { %p2858_p7 = pnand %p2856_p5, %p2853_p3 }
  0x60   : > { %2861 = shalt.err (!%p2858_p7)
}
  0x61   : > { %s2862_s18 = scalar_lea.vmem %s277_s23, 12288  ;;  %p2870_p1 = scmp.lt.s32.totalorder %s277_s23, %s277_s23 }
  0x62   : > { %p2863_p9 = scmp.ne.s32.totalorder %s277_s23, %s2862_s18  ;;  %p2871_p2 = scmp.lt.s32.totalorder %s2862_s18, %s2862_s18 }
  0x64   : > { %p2865_p12 = pnand %p2863_p9, %p3175_p13  ;;  %p2872_p4 = por %p2871_p2, %p2870_p1 }
  0x66   : > { %p2866_p0 = pneg %p2865_p12 }
  0x68   : > { %p2873_p8 = pnand %p2872_p4, %p2866_p0 }
  0x6a   : > { %2876 = shalt.err (!%p2873_p8)
}
  0x6b   : > { %s3056_s14 = smov 256   ;;  %s3057_s19 = smov 16  }
  0x6c   : > { %2697 = dma.hbm_to_vmem [thread:$0]  (!%p3161_p11), %s3606_s4, 12288, %s277_s23, [#allocation9], %s3056_s14, %s3056_s14, %s3057_s19  }
  0x6d   : > { %s3058_s12 = smov [#allocation11]   ;;  %s3607_s5 = sld [smem:[#allocation25_spill]] }
  0x6e   : > { %s289_s20 = sshll.u32 %s3058_s12, 4  ;;  %s290_s20 = int_to_ptr.vmem [resolvable:$true] %s289_s20 }
  0x73   : > { %s2877_s25 = scalar_lea.hbm %s3607_s5, 6144 }
  0x74   : > { %p2878_p4 = scmp.ne.s32.totalorder %s3607_s5, %s2877_s25  ;;  %p2884_p10 = scmp.lt.u32.totalorder %s2877_s25, %s3607_s5 }
  0x76   : > { %p2880_p8 = pnand %p2878_p4, %p3175_p13 }
  0x78   : > { %p2881_p6 = pneg %p2880_p8 }
  0x7a   : > { %p2886_p3 = pnand %p2884_p10, %p2881_p6 }
  0x7c   : > { %2889 = shalt.err (!%p2886_p3)
}
  0x7d   : > { %s2890_s23 = scalar_lea.vmem %s290_s20, 6144  ;;  %p2898_p12 = scmp.lt.s32.totalorder %s290_s20, %s290_s20 }
  0x7e   : > { %p2891_p5 = scmp.ne.s32.totalorder %s290_s20, %s2890_s23  ;;  %p2899_p0 = scmp.lt.s32.totalorder %s2890_s23, %s2890_s23 }
  0x80   : > { %p2893_p7 = pnand %p2891_p5, %p3175_p13  ;;  %p2900_p1 = por %p2899_p0, %p2898_p12 }
  0x82   : > { %p2894_p9 = pneg %p2893_p7 }
  0x84   : > { %p2901_p2 = pnand %p2900_p1, %p2894_p9 }
  0x86   : > { %2904 = shalt.err (!%p2901_p2)
}
  0x87   : > { %s3608_s14 = smov 8   ;;  %s3609_s19 = smov 128  }
  0x88   : > { %2700 = dma.hbm_to_vmem [thread:$0]  (!%p3161_p11), %s3607_s5, 6144, %s290_s20, [#allocation12], %s3609_s19, %s3609_s19, %s3608_s14  }
  0x89   : > { %s3262_s24 = sadd.s32 1, %s3047_s30   ;;  %s36_s16 = sadd.s32 1, %s3043_s29 }
  0x8a   : > { %s33_s12 = ssub.s32 %s3047_s30, %s3262_s24  ;;  %p43_p13 = scmp.ne.s32.totalorder %s3043_s29, %s3039_s28 }
  0x8b   : > { %p34_p4 = scmp.eq.s32.totalorder %s33_s12, 0  ;;  %p44_p8 = scmp.eq.s32.totalorder %s3047_s30, 0 }
  0x8c   : > { %p3610_p6 = scmp.eq.s32.totalorder %s3131_s9, 1  ;;  %p2716_p3 = scmp.lt.s32.totalorder %s3047_s30, 2 }
  0x8d   : > { %s3278_s22 = scalar_select %p34_p4, %s3043_s29, %s36_s16  }
  0x8e   : > { %p3272_p10 = por %p3610_p6, %p43_p13  ;;  %p45_p5 = por %p44_p8, %p43_p13 }
  0x8f   : > { %3612 = sst [smem:[#allocation21_spill]] %s3278_s22  ;;  %s309_s25 = sand.u32 1, %s3043_s29  }
  0x90   : > { %s2017_s26 = sshll.u32 %s309_s25, 4  ;;  %s2053_s20 = sshll.u32 %s3047_s30, 8 }
  0x91   : > { %s3285_s18 = scalar_lea.hbm %s3577_s0, %s2053_s20  ;;  %s313_s23 = scalar_lea.vmem [#allocation2], %s2017_s26 }
  0x92   : > { %s320_s2 = sshll.u32 %s313_s23, 4  ;;  %p3289_p11 = pnand %p2716_p3, %p45_p5  ;;  %s3287_s2 = int_to_ptr.vmem [resolvable:$true] %s320_s2 }
  0x93   : > { %s3296_s10 = scalar_lea.hbm %s3578_s1, %s2053_s20  ;;  %s334_s15 = scalar_lea.vmem [#allocation5], %s2017_s26 }
  0x94   : > { %s3298_s3 = sshll.u32 %s334_s15, 4  ;;  %s3300_s4 = scalar_lea.sflag [#allocation3], %s309_s25  ;;  %s3332_s3 = int_to_ptr.vmem [resolvable:$true] %s3298_s3 }
  0x95   : > { %s2905_s23 = scalar_lea.hbm %s3285_s18, 256  ;;  %p2907_p9 = pneg %p3289_p11 }
  0x96   : > { %p2906_p7 = scmp.ne.s32.totalorder %s3285_s18, %s2905_s23  ;;  %s2910_s16 = scalar_lea.hbm %s3577_s0, 512 }
  0x97   : > { %p2911_p1 = scmp.lt.u32.totalorder %s3285_s18, %s3577_s0  ;;  %p2912_p2 = scmp.lt.u32.totalorder %s2910_s16, %s2905_s23 }
  0x98   : > { %p2908_p12 = pnand %p2907_p9, %p2906_p7  ;;  %p2914_p4 = scmp.lt.u32.totalorder %s2905_s23, %s3285_s18 }
  0x99   : > { %p2913_p13 = por %p2912_p2, %p2911_p1 }
  0x9a   : > { %p2909_p0 = pneg %p2908_p12 }
  0x9b   : > { %p2915_p8 = por %p2914_p4, %p2913_p13 }
  0x9d   : > { %p2916_p6 = pnand %p2915_p8, %p2909_p0 }
  0x9f   : > { %2919 = shalt.err (!%p2916_p6)
}
  0xa0   : > { %s2920_s25 = scalar_lea.vmem %s3287_s2, 256  ;;  %s3059_s5 = smov [#allocation2]  }
  0xa1   : > { %p2921_p3 = scmp.ne.s32.totalorder %s3287_s2, %s2920_s25  ;;  %s2925_s22 = sshll.u32 %s3059_s5, 4  ;;  %s2926_s22 = int_to_ptr.vmem [resolvable:$false] %s2925_s22 }
  0xa2   : > { %s2927_s26 = scalar_lea.vmem %s2926_s22, 512  ;;  %p2928_p12 = scmp.lt.s32.totalorder %s3287_s2, %s2926_s22 }
  0xa3   : > { %p2923_p5 = pnand %p2921_p3, %p2907_p9  ;;  %p2929_p1 = scmp.lt.s32.totalorder %s2927_s26, %s2920_s25 }
  0xa5   : > { %p2924_p7 = pneg %p2923_p5  ;;  %p2930_p2 = por %p2929_p1, %p2928_p12 }
  0xa7   : > { %p2931_p13 = pnand %p2930_p2, %p2924_p7 }
  0xa9   : > { %2934 = shalt.err (!%p2931_p13)
}
  0xaa   : > { %2704 = dma.hbm_to_vmem [thread:$0]  (!%p3289_p11), %s3285_s18, 256, %s3287_s2, %s3300_s4, %s3609_s19, %s3609_s19, %s3608_s14  }
  0xab   : > { %s330_s15 = sand.u32 1, %s3047_s30   ;;  %s2935_s16 = scalar_lea.hbm %s3296_s10, 256 }
  0xac   : > { %s3335_s23 = scalar_lea.sflag [#allocation6], %s330_s15  ;;  %p2936_p0 = scmp.ne.s32.totalorder %s3296_s10, %s2935_s16 }
  0xad   : > { %s2940_s25 = scalar_lea.hbm %s3578_s1, 512  ;;  %p2941_p6 = scmp.lt.u32.totalorder %s3296_s10, %s3578_s1 }
  0xae   : > { %p2938_p4 = pnand %p2936_p0, %p2907_p9  ;;  %p2942_p3 = scmp.lt.u32.totalorder %s2940_s25, %s2935_s16 }
  0xaf   : > { %p2944_p7 = scmp.lt.u32.totalorder %s2935_s16, %s3296_s10 }
  0xb0   : > { %p2939_p8 = pneg %p2938_p4  ;;  %p2943_p5 = por %p2942_p3, %p2941_p6 }
  0xb2   : > { %p2945_p12 = por %p2944_p7, %p2943_p5 }
  0xb4   : > { %p2946_p1 = pnand %p2945_p12, %p2939_p8 }
  0xb6   : > { %2949 = shalt.err (!%p2946_p1)
}
  0xb7   : > { %s2950_s4 = scalar_lea.vmem %s3332_s3, 256  ;;  %s3060_s18 = smov [#allocation5]  }
  0xb8   : > { %p2951_p2 = scmp.ne.s32.totalorder %s3332_s3, %s2950_s4  ;;  %s2955_s2 = sshll.u32 %s3060_s18, 4  ;;  %s2956_s2 = int_to_ptr.vmem [resolvable:$false] %s2955_s2 }
  0xb9   : > { %s2957_s26 = scalar_lea.vmem %s2956_s2, 512  ;;  %p2958_p4 = scmp.lt.s32.totalorder %s3332_s3, %s2956_s2 }
  0xba   : > { %p2953_p13 = pnand %p2951_p2, %p2907_p9  ;;  %p2959_p6 = scmp.lt.s32.totalorder %s2957_s26, %s2950_s4 }
  0xbc   : > { %p2954_p0 = pneg %p2953_p13  ;;  %p2960_p3 = por %p2959_p6, %p2958_p4 }
  0xbe   : > { %p2961_p5 = pnand %p2960_p3, %p2954_p0 }
  0xc0   : > { %2964 = shalt.err (!%p2961_p5)
}
  0xc1   : > { %2707 = dma.hbm_to_vmem [thread:$0]  (!%p3289_p11), %s3296_s10, 256, %s3332_s3, %s3335_s23, %s3609_s19, %s3609_s19, %s3608_s14  }
  0xc2   : > { %p3614_p9 = scmp.ne.s32.totalorder %s3601_s13, 0 }
  0xc3   : > { %s3367_s15 = sand.u32 (!%p3614_p9), 1, %s3039_s28   ;;  %p3615_p8 = scmp.ne.s32.totalorder (!%p3614_p9), %s3598_s11, 0 }
  0xc4   : > { %353 = sbr.rel (%p3614_p9) target bundleno = 1603 (0x643), region = 52  ;;  %s3370_s16 = sshll.u32 (!%p3614_p9), %s3367_s15, 4 }
  0xc5   : > { %s356_s17 = scalar_lea.sflag (!%p3614_p9), [#allocation3], %s3367_s15  ;;  %s3374_s12 = scalar_lea.vmem (!%p3614_p9), [#allocation2], %s3370_s16 }
  0xcb   : > { %3010 = dma.done.wait (%p3615_p8), %s356_s17, 256  }
  0xcc   : > { %3012 = vsyncadd (%p3615_p8), %s356_s17, 4294967040  ;;  %s364_s3 = sand.u32 1, %s3131_s9   ;;  %s3382_s14 = scalar_lea.vmem [#allocation5], %s3370_s16 }
  0xcd   : > { %s365_s13 = scalar_lea.sflag [#allocation6], %s364_s3 }
  0xce   : > { %3014 = dma.done.wait (%p3615_p8), %s365_s13, 256  }
  0xcf   : > { %3016 = vsyncadd (%p3615_p8), %s365_s13, 4294967040  ;;  %p3616_p11 = scmp.eq.s32.totalorder %s3131_s9, 0 }
  0xd1   : > { %3018 = dma.done.wait (%p3616_p11), [#allocation6], 256   ;;  %p3617_p7 = pmov %p3616_p11 }
  0xd3   : > { %3020 = vsyncadd (%p3617_p7), [#allocation6], 4294967040  ;;  %p3618_p12 = pmov %p3617_p7 }
  0xd4   : > { %p3619_p1 = pmov %p3617_p7 }
  0xd5   : > { %3022 = dma.done.wait (%p3618_p12), [#allocation9], 30720  }
  0xd6   : > { %3024 = vsyncadd (%p3619_p1), [#allocation9], 4294936576  ;;  %p3620_p2 = pmov %p3619_p1 }
  0xd7   : > { %p3621_p13 = pmov %p3619_p1 }
  0xd8   : > { %3026 = dma.done.wait (%p3620_p2), [#allocation12], 6144  }
  0xd9   : > { %3028 = vsyncadd (%p3621_p13), [#allocation12], 4294961152  ;;  %vm428_vm0 = vcmask 130048   ;;  %v3401_v0 = vld [vmem:[%s3374_s12] sm:$0xff]  ;;  %v3404_v1 = vld [vmem:[%s3374_s12 + $0x8] sm:$0xff]  ;;  %s2055_s20 = sshll.u32 %s3131_s9, 8 }
  0xda   : > { %v3406_v2 = vld [vmem:[#allocation7] sm:$0xff]  ;;  %v2304_v3 = vpack.c.bf16 %v3404_v1, %v3401_v0  ;;  %v3416_v5 = vld [vmem:[%s3382_s14 + $0x8] sm:$0xff]  ;;  %v747_v8 = vld [vmem:[#allocation8 + $0x20] sm:$0xff]  ;;  %s421_s25 = scalar_lea.vmem [#allocation13], %s3370_s16  ;;  %s3531_s18 = scalar_lea.hbm %s3585_s8, %s2055_s20 }
  0xdb   : > { %2196 = vmatprep.mubr.msk.f32.mxu0 %vm428_vm0, %v3406_v2  ;;  %v3413_v4 = vld [vmem:[%s3382_s14] sm:$0xff]  ;;  %2203 = vmatprep.mubr.msk.f32.mxu1 %vm428_vm0, %v3406_v2  ;;  %v744_v7 = vld [vmem:[#allocation8 + $0x8] sm:$0xff]  ;;  %v3422_v9 = vld [vmem:[#allocation7 + $0x8] sm:$0xff]  ;;  %s1876_s5 = sshll.u32 %s421_s25, 4  ;;  %s1863_s9 = scalar_lea.sflag [#allocation4], %s3367_s15  ;;  %s3533_s5 = int_to_ptr.vmem [resolvable:$true] %s1876_s5 }
  0xdc   : > { %v2312_v6 = vpack.c.bf16 %v3416_v5, %v3413_v4  ;;  %2305 = vmatprep.subr.bf16.mxu0 %v2304_v3  ;;  %v2320_v10 = vpack.c.bf16 %v747_v8, %v744_v7  ;;  %v743_v11 = vld [vmem:[#allocation8] sm:$0xff]  ;;  %v746_v12 = vld [vmem:[#allocation8 + $0x18] sm:$0xff]  ;;  %v753_v14 = vld [vmem:[#allocation8 + $0x50] sm:$0xff]  ;;  %s2965_s2 = scalar_lea.vmem %s3533_s5, 256  ;;  %s3062_s26 = smov [#allocation13]  }
  0xdd   : > { %2307 = vmatpush3.bf16.msra.mxu0 %v2304_v3  ;;  %v750_v13 = vld [vmem:[#allocation8 + $0x38] sm:$0xff]  ;;  %v2322_v15 = vpack.c.bf16 %v746_v12, %v743_v11  ;;  %v749_v17 = vld [vmem:[#allocation8 + $0x30] sm:$0xff]  ;;  %v752_v18 = vld [vmem:[#allocation8 + $0x48] sm:$0xff]  ;;  %p2966_p0 = scmp.ne.s32.totalorder %s3533_s5, %s2965_s2  ;;  %s2969_s16 = sshll.u32 %s3062_s26, 4  ;;  %s2970_s16 = int_to_ptr.vmem [resolvable:$false] %s2969_s16 }
  0xde   : > { %2313 = vmatprep.subr.bf16.mxu0 %v2312_v6  ;;  %v2324_v16 = vpack.c.bf16 %v753_v14, %v750_v13  ;;  %v756_v19 = vld [vmem:[#allocation8 + $0x68] sm:$0xff]  ;;  %v759_v20 = vld [vmem:[#allocation8 + $0x80] sm:$0xff]  ;;  %v2326_v21 = vpack.c.bf16 %v752_v18, %v749_v17  ;;  %v758_v24 = vld [vmem:[#allocation8 + $0x78] sm:$0xff]  ;;  %s2971_s17 = scalar_lea.vmem %s2970_s16, 512  ;;  %p2972_p3 = scmp.lt.s32.totalorder %s3533_s5, %s2970_s16 }
  0xdf   : > { %v2328_v22 = vpack.c.bf16 %v759_v20, %v756_v19  ;;  %v755_v23 = vld [vmem:[#allocation8 + $0x60] sm:$0xff]  ;;  %v762_v25 = vld [vmem:[#allocation8 + $0x98] sm:$0xff]  ;;  %v765_v26 = vld [vmem:[#allocation8 + $0xb0] sm:$0xff]  ;;  %p2967_p4 = pnand %p2966_p0, %p3272_p10  ;;  %p2973_p5 = scmp.lt.s32.totalorder %s2971_s17, %s2965_s2 }
  0xe0   : > { %2197 = vmatmul.mubr.msk.f32.vlgmr.msra.gmra.mrb[0].mxu0 %vm428_vm0, %v3422_v9  ;;  %v2330_v27 = vpack.c.bf16 %v758_v24, %v755_v23  ;;  %v2332_v28 = vpack.c.bf16 %v765_v26, %v762_v25  ;;  %v761_v29 = vld [vmem:[#allocation8 + $0x90] sm:$0xff]  ;;  %v764_v30 = vld [vmem:[#allocation8 + $0xa8] sm:$0xff]  ;;  %v771_v32 = vld [vmem:[#allocation8 + $0xe0] sm:$0xff] }
  0xe1   : > { %2315 = vmatpush3.bf16.msra.mxu0 %v2312_v6  ;;  %2210 = vmatprep.mubr.msk.f32.mxu0 %vm428_vm0, %v3406_v2  ;;  %v768_v31 = vld [vmem:[#allocation8 + $0xc8] sm:$0xff]  ;;  %v2334_v33 = vpack.c.bf16 %v764_v30, %v761_v29  ;;  %v767_v35 = vld [vmem:[#allocation8 + $0xc0] sm:$0xff]  ;;  %v770_v36 = vld [vmem:[#allocation8 + $0xd8] sm:$0xff]  ;;  %p2968_p6 = pneg %p2967_p4  ;;  %p2974_p9 = por %p2973_p5, %p2972_p3 }
  0xe2   : > { %2321 = vmatprep.subr.bf16.mxu0 %v2320_v10  ;;  %v2336_v34 = vpack.c.bf16 %v771_v32, %v768_v31  ;;  %v774_v37 = vld [vmem:[#allocation8 + $0xf8] sm:$0xff]  ;;  %v777_v38 = vld [vmem:[#allocation8 + $0x110] sm:$0xff]  ;;  %v2338_v39 = vpack.c.bf16 %v770_v36, %v767_v35  ;;  %v776_v42 = vld [vmem:[#allocation8 + $0x108] sm:$0xff] }
  0xe3   : > { %v2340_v40 = vpack.c.bf16 %v777_v38, %v774_v37  ;;  %v773_v41 = vld [vmem:[#allocation8 + $0xf0] sm:$0xff]  ;;  %v780_v43 = vld [vmem:[#allocation8 + $0x128] sm:$0xff]  ;;  %v783_v44 = vld [vmem:[#allocation8 + $0x140] sm:$0xff]  ;;  %p2975_p8 = pnand %p2974_p9, %p2968_p6 }
  0xe4   : > { %2211 = vmatmul.mubr.msk.f32.vlgmr.msra.gmra.mrb[2].mxu0 %vm428_vm0, %v3422_v9  ;;  %v2342_v45 = vpack.c.bf16 %v776_v42, %v773_v41  ;;  %v2344_v46 = vpack.c.bf16 %v783_v44, %v780_v43  ;;  %v779_v47 = vld [vmem:[#allocation8 + $0x120] sm:$0xff]  ;;  %v782_v48 = vld [vmem:[#allocation8 + $0x138] sm:$0xff]  ;;  %v789_v50 = vld [vmem:[#allocation8 + $0x170] sm:$0xff] }
  0xe5   : > { %2323 = vmatpush1.bf16.msra.mxu0 %v2322_v15  ;;  %v786_v49 = vld [vmem:[#allocation8 + $0x158] sm:$0xff]  ;;  %v2346_v51 = vpack.c.bf16 %v782_v48, %v779_v47  ;;  %v785_v53 = vld [vmem:[#allocation8 + $0x150] sm:$0xff]  ;;  %v788_v54 = vld [vmem:[#allocation8 + $0x168] sm:$0xff] }
  0xe6   : > { %2325 = vmatprep.subr.bf16.mxu0 %v2324_v16  ;;  %v2348_v52 = vpack.c.bf16 %v789_v50, %v786_v49  ;;  %v792_v55 = vld [vmem:[#allocation8 + $0x188] sm:$0xff]  ;;  %v795_v56 = vld [vmem:[#allocation8 + $0x1a0] sm:$0xff]  ;;  %v2350_v57 = vpack.c.bf16 %v788_v54, %v785_v53  ;;  %v794_v60 = vld [vmem:[#allocation8 + $0x198] sm:$0xff] }
  0xe7   : > { %v2352_v58 = vpack.c.bf16 %v795_v56, %v792_v55  ;;  %v791_v59 = vld [vmem:[#allocation8 + $0x180] sm:$0xff]  ;;  %v798_v61 = vld [vmem:[#allocation8 + $0x1b8] sm:$0xff]  ;;  %v801_v62 = vld [vmem:[#allocation8 + $0x1d0] sm:$0xff] }
  0xe8   : > { %v2354_v63 = vpack.c.bf16 %v794_v60, %v791_v59  ;;  %v2356_v3 = vpack.c.bf16 %v801_v62, %v798_v61  ;;  %v797_v6 = vld [vmem:[#allocation8 + $0x1b0] sm:$0xff]  ;;  %v800_v7 = vld [vmem:[#allocation8 + $0x1c8] sm:$0xff]  ;;  %v807_v10 = vld [vmem:[#allocation8 + $0x200] sm:$0xff] }
  0xe9   : > { %2327 = vmatpush1.bf16.msra.mxu0 %v2326_v21  ;;  %v804_v8 = vld [vmem:[#allocation8 + $0x1e8] sm:$0xff]  ;;  %v2358_v11 = vpack.c.bf16 %v800_v7, %v797_v6  ;;  %v803_v13 = vld [vmem:[#allocation8 + $0x1e0] sm:$0xff]  ;;  %v806_v14 = vld [vmem:[#allocation8 + $0x1f8] sm:$0xff] }
  0xea   : > { %2329 = vmatprep.subr.bf16.mxu0 %v2328_v22  ;;  %v2360_v12 = vpack.c.bf16 %v807_v10, %v804_v8  ;;  %v810_v15 = vld [vmem:[#allocation8 + $0x218] sm:$0xff]  ;;  %v813_v16 = vld [vmem:[#allocation8 + $0x230] sm:$0xff]  ;;  %v2362_v17 = vpack.c.bf16 %v806_v14, %v803_v13  ;;  %v812_v20 = vld [vmem:[#allocation8 + $0x228] sm:$0xff] }
  0xeb   : > { %v2364_v18 = vpack.c.bf16 %v813_v16, %v810_v15  ;;  %v809_v19 = vld [vmem:[#allocation8 + $0x210] sm:$0xff]  ;;  %v816_v21 = vld [vmem:[#allocation8 + $0x248] sm:$0xff]  ;;  %v819_v22 = vld [vmem:[#allocation8 + $0x260] sm:$0xff] }
  0xec   : > { %v2366_v23 = vpack.c.bf16 %v812_v20, %v809_v19  ;;  %v2368_v24 = vpack.c.bf16 %v819_v22, %v816_v21  ;;  %v815_v25 = vld [vmem:[#allocation8 + $0x240] sm:$0xff]  ;;  %v818_v26 = vld [vmem:[#allocation8 + $0x258] sm:$0xff]  ;;  %v821_v31 = vld [vmem:[#allocation8 + $0x270] sm:$0xff] }
  0xed   : > { %2331 = vmatpush1.bf16.msra.mxu0 %v2330_v27  ;;  %v822_v27 = vld [vmem:[#allocation8 + $0x278] sm:$0xff]  ;;  %v2370_v29 = vpack.c.bf16 %v818_v26, %v815_v25  ;;  %v824_v32 = vld [vmem:[#allocation8 + $0x288] sm:$0xff]  ;;  %v827_v37 = vld [vmem:[#allocation8 + $0x2a0] sm:$0xff] }
  0xee   : > { %2333 = vmatprep.subr.bf16.mxu0 %v2332_v28  ;;  %v825_v28 = vld [vmem:[#allocation8 + $0x290] sm:$0xff]  ;;  %v2374_v35 = vpack.c.bf16 %v824_v32, %v821_v31  ;;  %v830_v38 = vld [vmem:[#allocation8 + $0x2b8] sm:$0xff]  ;;  %v836_v44 = vld [vmem:[#allocation8 + $0x2e8] sm:$0xff] }
  0xef   : > { %v2372_v30 = vpack.c.bf16 %v825_v28, %v822_v27  ;;  %v2378_v41 = vpack.c.bf16 %v830_v38, %v827_v37  ;;  %v833_v43 = vld [vmem:[#allocation8 + $0x2d0] sm:$0xff]  ;;  %v1194_v47 = vld [vmem:[#allocation10 + $0x18] sm:$0xff]  ;;  %v1191_v49 = vld [vmem:[#allocation10] sm:$0xff] }
  0xf0   : > { %v1193_v50 = vld [vmem:[#allocation10 + $0x10] sm:$0xff]  ;;  %v1195_v56 = vld [vmem:[#allocation10 + $0x20] sm:$0xff]  ;;  %v1200_v60 = vld [vmem:[#allocation10 + $0x48] sm:$0xff] }
  0xf1   : > { %2335 = vmatpush1.bf16.msra.mxu0 %v2334_v33  ;;  %v828_v33 = vld [vmem:[#allocation8 + $0x2a8] sm:$0xff]  ;;  %v2482_v54 = vpack.c.bf16 %v1193_v50, %v1191_v49  ;;  %v1202_v61 = vld [vmem:[#allocation10 + $0x58] sm:$0xff]  ;;  %v843_v6 = vld [vmem:[#allocation8 + $0x320] sm:$0xff] }
  0xf2   : > { %2337 = vmatprep.subr.bf16.mxu0 %v2336_v34  ;;  %v831_v34 = vld [vmem:[#allocation8 + $0x2c0] sm:$0xff]  ;;  %v1201_v10 = vld [vmem:[#allocation10 + $0x50] sm:$0xff]  ;;  %v1204_v13 = vld [vmem:[#allocation10 + $0x68] sm:$0xff] }
  0xf3   : > { %v2376_v36 = vpack.c.bf16 %v831_v34, %v828_v33  ;;  %v1199_v8 = vld [vmem:[#allocation10 + $0x40] sm:$0xff]  ;;  %v1206_v14 = vld [vmem:[#allocation10 + $0x78] sm:$0xff]  ;;  %v849_v20 = vld [vmem:[#allocation8 + $0x350] sm:$0xff] }
  0xf4   : > { %v839_v16 = vld [vmem:[#allocation8 + $0x300] sm:$0xff]  ;;  %v846_v19 = vld [vmem:[#allocation8 + $0x338] sm:$0xff]  ;;  %v2492_v21 = vpack.c.bf16 %v1206_v14, %v1204_v13  ;;  %v845_v28 = vld [vmem:[#allocation8 + $0x330] sm:$0xff] }
  0xf5   : > { %2339 = vmatpush1.bf16.msra.mxu0 %v2338_v39  ;;  %v834_v39 = vld [vmem:[#allocation8 + $0x2d8] sm:$0xff]  ;;  %v1203_v22 = vld [vmem:[#allocation10 + $0x60] sm:$0xff]  ;;  %v2388_v27 = vpack.c.bf16 %v849_v20, %v846_v19  ;;  %v852_v31 = vld [vmem:[#allocation8 + $0x368] sm:$0xff] }
  0xf6   : > { %2341 = vmatprep.subr.bf16.mxu0 %v2340_v40  ;;  %v837_v40 = vld [vmem:[#allocation8 + $0x2f0] sm:$0xff]  ;;  %v1210_v25 = vld [vmem:[#allocation10 + $0x98] sm:$0xff]  ;;  %v855_v32 = vld [vmem:[#allocation8 + $0x380] sm:$0xff] }
  0xf7   : > { %v2380_v42 = vpack.c.bf16 %v837_v40, %v834_v39  ;;  %v1207_v34 = vld [vmem:[#allocation10 + $0x80] sm:$0xff]  ;;  %v1214_v37 = vld [vmem:[#allocation10 + $0xb8] sm:$0xff]  ;;  %v857_v50 = vld [vmem:[#allocation8 + $0x390] sm:$0xff] }
  0xf8   : > { %v851_v39 = vld [vmem:[#allocation8 + $0x360] sm:$0xff]  ;;  %v854_v40 = vld [vmem:[#allocation8 + $0x378] sm:$0xff]  ;;  %v1221_v14 = vld [vmem:[#allocation10 + $0xf0] sm:$0xff] }
  0xf9   : > { %2343 = vmatpush1.bf16.msra.mxu0 %v2342_v45  ;;  %v2382_v45 = vpack.c.bf16 %v836_v44, %v833_v43  ;;  %v861_v43 = vld [vmem:[#allocation8 + $0x3b0] sm:$0xff]  ;;  %v1219_v13 = vld [vmem:[#allocation10 + $0xe0] sm:$0xff]  ;;  %v872_v20 = vld [vmem:[#allocation8 + $0x408] sm:$0xff] }
  0xfa   : > { %2345 = vmatprep.subr.bf16.mxu0 %v2344_v46  ;;  %v1192_v46 = vld [vmem:[#allocation10 + $0x8] sm:$0xff]  ;;  %v869_v19 = vld [vmem:[#allocation8 + $0x3f0] sm:$0xff] }
  0xfb   : > { %v2480_v48 = vpack.c.bf16 %v1194_v47, %v1192_v46  ;;  %v1216_v46 = vld [vmem:[#allocation10 + $0xc8] sm:$0xff]  ;;  %v1218_v47 = vld [vmem:[#allocation10 + $0xd8] sm:$0xff] }
  0xfd   : > { %2347 = vmatpush1.bf16.msra.mxu0 %v2346_v51  ;;  %v1196_v51 = vld [vmem:[#allocation10 + $0x28] sm:$0xff] }
  0xfe   : > { %2349 = vmatprep.subr.bf16.mxu0 %v2348_v52  ;;  %v1198_v52 = vld [vmem:[#allocation10 + $0x38] sm:$0xff] }
  0xff   : > { %v2484_v59 = vpack.c.bf16 %v1198_v52, %v1196_v51  ;;  %v860_v51 = vld [vmem:[#allocation8 + $0x3a8] sm:$0xff] }
 0x101   : > { %2351 = vmatpush1.bf16.msra.mxu0 %v2350_v57  ;;  %v1197_v57 = vld [vmem:[#allocation10 + $0x30] sm:$0xff] }
 0x102   : > { %2353 = vmatprep.subr.bf16.mxu0 %v2352_v58 }
 0x105   : > { %2355 = vmatpush1.bf16.msra.mxu0 %v2354_v63  ;;  %v2486_v63 = vpack.c.bf16 %v1197_v57, %v1195_v56  ;;  %v867_v56 = vld [vmem:[#allocation8 + $0x3e0] sm:$0xff]  ;;  %v2504_v57 = vpack.c.bf16 %v1218_v47, %v1216_v46  ;;  %v1237_v47 = vld [vmem:[#allocation10 + $0x170] sm:$0xff] }
 0x106   : > { %2357 = vmatprep.subr.bf16.mxu0 %v2356_v3  ;;  %v840_v3 = vld [vmem:[#allocation8 + $0x308] sm:$0xff]  ;;  %v1235_v46 = vld [vmem:[#allocation10 + $0x160] sm:$0xff] }
 0x107   : > { %v2384_v15 = vpack.c.bf16 %v843_v6, %v840_v3  ;;  %v863_v6 = vld [vmem:[#allocation8 + $0x3c0] sm:$0xff] }
 0x109   : > { %2359 = vmatpush1.bf16.msra.mxu0 %v2358_v11 }
 0x10a   : > { %2361 = vmatprep.subr.bf16.mxu0 %v2360_v12  ;;  %v2488_v12 = vpack.c.bf16 %v1202_v61, %v1200_v60  ;;  %v1220_v60 = vld [vmem:[#allocation10 + $0xe8] sm:$0xff]  ;;  %v1222_v61 = vld [vmem:[#allocation10 + $0xf8] sm:$0xff] }
 0x10d   : > { %2363 = vmatpush1.bf16.msra.mxu0 %v2362_v17  ;;  %v842_v17 = vld [vmem:[#allocation8 + $0x318] sm:$0xff] }
 0x10e   : > { %2365 = vmatprep.subr.bf16.mxu0 %v2364_v18  ;;  %v2490_v18 = vpack.c.bf16 %v1201_v10, %v1199_v8  ;;  %v2386_v26 = vpack.c.bf16 %v842_v17, %v839_v16  ;;  %v870_v10 = vld [vmem:[#allocation8 + $0x3f8] sm:$0xff] }
 0x10f   : > { %v1226_v16 = vld [vmem:[#allocation10 + $0x118] sm:$0xff] }
 0x111   : > { %2367 = vmatpush1.bf16.msra.mxu0 %v2366_v23  ;;  %v1205_v23 = vld [vmem:[#allocation10 + $0x70] sm:$0xff] }
 0x112   : > { %2369 = vmatprep.subr.bf16.mxu0 %v2368_v24  ;;  %v1208_v24 = vld [vmem:[#allocation10 + $0x88] sm:$0xff] }
 0x113   : > { %v2496_v33 = vpack.c.bf16 %v1210_v25, %v1208_v24  ;;  %v1223_v25 = vld [vmem:[#allocation10 + $0x100] sm:$0xff] }
 0x115   : > { %2371 = vmatpush1.bf16.msra.mxu0 %v2370_v29  ;;  %v848_v29 = vld [vmem:[#allocation8 + $0x348] sm:$0xff] }
 0x116   : > { %2373 = vmatprep.subr.bf16.mxu0 %v2372_v30  ;;  %v2494_v30 = vpack.c.bf16 %v1205_v23, %v1203_v22  ;;  %v2390_v38 = vpack.c.bf16 %v848_v29, %v845_v28  ;;  %v876_v22 = vld [vmem:[#allocation8 + $0x428] sm:$0xff]  ;;  %v879_v23 = vld [vmem:[#allocation8 + $0x440] sm:$0xff]  ;;  %v1230_v28 = vld [vmem:[#allocation10 + $0x138] sm:$0xff]  ;;  %v2406_v29 = vpack.c.bf16 %v872_v20, %v869_v19 }
 0x119   : > { %2375 = vmatpush1.bf16.msra.mxu0 %v2374_v35  ;;  %v1209_v35 = vld [vmem:[#allocation10 + $0x90] sm:$0xff] }
 0x11a   : > { %2377 = vmatprep.subr.bf16.mxu0 %v2376_v36  ;;  %v1212_v36 = vld [vmem:[#allocation10 + $0xa8] sm:$0xff] }
 0x11b   : > { %v2500_v44 = vpack.c.bf16 %v1214_v37, %v1212_v36  ;;  %v1229_v36 = vld [vmem:[#allocation10 + $0x130] sm:$0xff]  ;;  %v1232_v37 = vld [vmem:[#allocation10 + $0x148] sm:$0xff] }
 0x11d   : > { %2379 = vmatpush1.bf16.msra.mxu0 %v2378_v41  ;;  %v2498_v41 = vpack.c.bf16 %v1209_v35, %v1207_v34  ;;  %v1227_v35 = vld [vmem:[#allocation10 + $0x120] sm:$0xff] }
 0x11e   : > { %2381 = vmatprep.subr.bf16.mxu0 %v2380_v42  ;;  %v858_v42 = vld [vmem:[#allocation8 + $0x398] sm:$0xff] }
 0x11f   : > { %v2396_v49 = vpack.c.bf16 %v861_v43, %v858_v42  ;;  %v1233_v42 = vld [vmem:[#allocation10 + $0x150] sm:$0xff]  ;;  %v1236_v43 = vld [vmem:[#allocation10 + $0x168] sm:$0xff] }
 0x121   : > { %2383 = vmatpush1.bf16.msra.mxu0 %v2382_v45  ;;  %v1211_v45 = vld [vmem:[#allocation10 + $0xa0] sm:$0xff] }
 0x122   : > { %2481 = vmatprep.subr.bf16.mxu0 %v2480_v48  ;;  %v2394_v48 = vpack.c.bf16 %v854_v40, %v851_v39  ;;  %v2518_v39 = vpack.c.bf16 %v1229_v36, %v1227_v35  ;;  %v1268_v35 = vld [vmem:[#allocation10 + $0x268] sm:$0xff]  ;;  %v1270_v36 = vld [vmem:[#allocation10 + $0x278] sm:$0xff] }
 0x1b3   : > { %v3430_v53 = vpop.f32.mrb[0].mxu0 }
 0x1b4   : > { %v3432_v55 = vpop.f32.mrb[1].mxu0 }
 0x1b5   : > { %951 = vmatprep.mubr.f32.mxu0 %v3432_v55  ;;  %v2308_v58 = vpack.c.bf16 %v3430_v53, %v3432_v55 }
 0x1b6   : > { %952 = vmatmul.mubr.f32.vlgmr.msra.gmra.mrb[4].mxu0 %v3401_v0 }
 0x1b7   : > { %2483 = vmatpush1.bf16.msra.mxu0 %v2482_v54  ;;  %2309 = vmatprep.subr.bf16.mxu1 %v2308_v58  ;;  %v3438_v62 = vpop.f32.mrb[2].mxu0  ;;  %v864_v54 = vld [vmem:[#allocation8 + $0x3c8] sm:$0xff] }
 0x1b8   : > { %957 = vmatprep.mubr.f32.mxu0 %v3430_v53  ;;  %2311 = vmatpush3.bf16.msra.mxu1 %v2308_v58  ;;  %v655_v7 = vpop.f32.mrb[3].mxu0  ;;  %v1215_v58 = vld [vmem:[#allocation10 + $0xc0] sm:$0xff]  ;;  %v2400_v3 = vpack.c.bf16 %v867_v56, %v864_v54  ;;  %v1241_v54 = vld [vmem:[#allocation10 + $0x190] sm:$0xff]  ;;  %v1244_v56 = vld [vmem:[#allocation10 + $0x1a8] sm:$0xff] }
 0x1b9   : > { %v2316_v11 = vpack.c.bf16 %v3438_v62, %v655_v7  ;;  %2485 = vmatprep.subr.bf16.mxu0 %v2484_v59  ;;  %v1217_v59 = vld [vmem:[#allocation10 + $0xd0] sm:$0xff] }
 0x1ba   : > { %958 = vmatmul.mubr.f32.gmra.mrb[6].mxu0 %v3404_v1  ;;  %v2506_v8 = vpack.c.bf16 %v1217_v59, %v1215_v58 }
 0x1bb   : > { %2487 = vmatpush1.bf16.msra.mxu0 %v2486_v63  ;;  %2204 = vmatmul.mubr.msk.f32.vlgmr.msra.gmra.mrb[0].mxu1 %vm428_vm0, %v3422_v9  ;;  %v2398_v63 = vpack.c.bf16 %v860_v51, %v857_v50  ;;  %v2526_v50 = vpack.c.bf16 %v1237_v47, %v1235_v46 }
 0x1bc   : > { %2317 = vmatprep.subr.bf16.mxu1 %v2316_v11  ;;  %1351 = vmatprep.mubr.f32.mxu0 %v655_v7  ;;  %v866_v7 = vld [vmem:[#allocation8 + $0x3d8] sm:$0xff] }
 0x1bd   : > { %2319 = vmatpush3.bf16.msra.mxu1 %v2316_v11  ;;  %2489 = vmatprep.subr.bf16.mxu0 %v2488_v12  ;;  %v873_v11 = vld [vmem:[#allocation8 + $0x410] sm:$0xff]  ;;  %v2508_v12 = vpack.c.bf16 %v1222_v61, %v1220_v60  ;;  %v2402_v17 = vpack.c.bf16 %v866_v7, %v863_v6  ;;  %v1243_v60 = vld [vmem:[#allocation10 + $0x1a0] sm:$0xff] }
 0x1be   : > { %2217 = vmatprep.mubr.msk.f32.mxu1 %vm428_vm0, %v3406_v2  ;;  %2385 = vmatprep.subr.bf16.mxu1 %v2384_v15  ;;  %v2392_v2 = vpack.c.bf16 %v855_v32, %v852_v31  ;;  %v1224_v15 = vld [vmem:[#allocation10 + $0x108] sm:$0xff]  ;;  %v875_v31 = vld [vmem:[#allocation8 + $0x420] sm:$0xff]  ;;  %v878_v32 = vld [vmem:[#allocation8 + $0x438] sm:$0xff] }
 0x1bf   : > { %2491 = vmatpush1.bf16.msra.mxu0 %v2490_v18  ;;  %v2404_v18 = vpack.c.bf16 %v873_v11, %v870_v10  ;;  %v2512_v24 = vpack.c.bf16 %v1226_v16, %v1224_v15  ;;  %v1245_v61 = vld [vmem:[#allocation10 + $0x1b0] sm:$0xff]  ;;  %v1252_v11 = vld [vmem:[#allocation10 + $0x1e8] sm:$0xff]  ;;  %v1251_v15 = vld [vmem:[#allocation10 + $0x1e0] sm:$0xff] }
 0x1c0   : > { %2218 = vmatmul.mubr.msk.f32.vlgmr.msra.gmra.mrb[2].mxu1 %vm428_vm0, %v3422_v9  ;;  %2493 = vmatprep.subr.bf16.mxu0 %v2492_v21  ;;  %v1213_v9 = vld [vmem:[#allocation10 + $0xb0] sm:$0xff]  ;;  %v2510_v21 = vpack.c.bf16 %v1221_v14, %v1219_v13  ;;  %v2534_v6 = vpack.c.bf16 %v1245_v61, %v1243_v60  ;;  %v1282_v60 = vld [vmem:[#allocation10 + $0x2d8] sm:$0xff]  ;;  %v1279_v61 = vld [vmem:[#allocation10 + $0x2c0] sm:$0xff] }
 0x1c1   : > { %2387 = vmatpush1.bf16.msra.mxu1 %v2386_v26  ;;  %v2502_v52 = vpack.c.bf16 %v1213_v9, %v1211_v45  ;;  %v1225_v26 = vld [vmem:[#allocation10 + $0x110] sm:$0xff] }
 0x1c2   : > { %2389 = vmatprep.subr.bf16.mxu1 %v2388_v27  ;;  %v1228_v27 = vld [vmem:[#allocation10 + $0x128] sm:$0xff]  ;;  %v1249_v10 = vld [vmem:[#allocation10 + $0x1d0] sm:$0xff] }
 0x1c3   : > { %2495 = vmatpush1.bf16.msra.mxu0 %v2494_v30  ;;  %v2408_v30 = vpack.c.bf16 %v879_v23, %v876_v22  ;;  %v2516_v34 = vpack.c.bf16 %v1230_v28, %v1228_v27  ;;  %v1253_v16 = vld [vmem:[#allocation10 + $0x1f0] sm:$0xff]  ;;  %v1260_v23 = vld [vmem:[#allocation10 + $0x228] sm:$0xff]  ;;  %v1259_v27 = vld [vmem:[#allocation10 + $0x220] sm:$0xff] }
 0x1c4   : > { %2497 = vmatprep.subr.bf16.mxu0 %v2496_v33  ;;  %v2514_v33 = vpack.c.bf16 %v1225_v26, %v1223_v25  ;;  %v2542_v19 = vpack.c.bf16 %v1253_v16, %v1251_v15  ;;  %v1257_v22 = vld [vmem:[#allocation10 + $0x210] sm:$0xff]  ;;  %v3061_v15 = vmov 0.0  }
 0x1c5   : > { %2391 = vmatpush1.bf16.msra.mxu1 %v2390_v38  ;;  %v1234_v38 = vld [vmem:[#allocation10 + $0x158] sm:$0xff]  ;;  %v1261_v28 = vld [vmem:[#allocation10 + $0x230] sm:$0xff]  ;;  %1028 = vmatprep.mubr.f32.mxu1 %v3061_v15 }
 0x1c6   : > { %2393 = vmatprep.subr.bf16.mxu1 %v2392_v2  ;;  %v2410_v2 = vpack.c.bf16 %v878_v32, %v875_v31  ;;  %v2520_v40 = vpack.c.bf16 %v1234_v38, %v1232_v37  ;;  %v2550_v31 = vpack.c.bf16 %v1261_v28, %v1259_v27  ;;  %v2556_v38 = vpack.c.bf16 %v1270_v36, %v1268_v35  ;;  %v802_v27 = vld [vmem:[#allocation8 + $0x1d8] sm:$0xff]  ;;  %v805_v36 = vld [vmem:[#allocation8 + $0x1f0] sm:$0xff] }
 0x1c7   : > { %2499 = vmatpush1.bf16.msra.mxu0 %v2498_v41  ;;  %v1231_v41 = vld [vmem:[#allocation10 + $0x140] sm:$0xff] }
 0x1c8   : > { %2501 = vmatprep.subr.bf16.mxu0 %v2500_v44  ;;  %v1238_v44 = vld [vmem:[#allocation10 + $0x178] sm:$0xff]  ;;  %v2522_v45 = vpack.c.bf16 %v1233_v42, %v1231_v41 }
 0x1c9   : > { %2395 = vmatpush1.bf16.msra.mxu1 %v2394_v48  ;;  %v2524_v9 = vpack.c.bf16 %v1238_v44, %v1236_v43  ;;  %v1240_v48 = vld [vmem:[#allocation10 + $0x188] sm:$0xff]  ;;  %v1274_v41 = vld [vmem:[#allocation10 + $0x298] sm:$0xff]  ;;  %v1271_v43 = vld [vmem:[#allocation10 + $0x280] sm:$0xff] }
 0x1ca   : > { %2397 = vmatprep.subr.bf16.mxu1 %v2396_v49  ;;  %v1242_v49 = vld [vmem:[#allocation10 + $0x198] sm:$0xff]  ;;  %v1273_v44 = vld [vmem:[#allocation10 + $0x290] sm:$0xff] }
 0x1cb   : > { %2503 = vmatpush1.bf16.msra.mxu0 %v2502_v52  ;;  %v2528_v51 = vpack.c.bf16 %v1242_v49, %v1240_v48  ;;  %v1239_v52 = vld [vmem:[#allocation10 + $0x180] sm:$0xff]  ;;  %v2562_v46 = vpack.c.bf16 %v1273_v44, %v1271_v43  ;;  %v1277_v49 = vld [vmem:[#allocation10 + $0x2b0] sm:$0xff] }
 0x1cc   : > { %2505 = vmatprep.subr.bf16.mxu0 %v2504_v57  ;;  %v1246_v57 = vld [vmem:[#allocation10 + $0x1b8] sm:$0xff]  ;;  %v2530_v58 = vpack.c.bf16 %v1241_v54, %v1239_v52  ;;  %v1275_v48 = vld [vmem:[#allocation10 + $0x2a0] sm:$0xff]  ;;  %v885_v52 = vld [vmem:[#allocation8 + $0x470] sm:$0xff] }
 0x1cd   : > { %2399 = vmatpush1.bf16.msra.mxu1 %v2398_v63  ;;  %v2532_v59 = vpack.c.bf16 %v1246_v57, %v1244_v56  ;;  %v1248_v63 = vld [vmem:[#allocation10 + $0x1c8] sm:$0xff]  ;;  %v881_v56 = vld [vmem:[#allocation8 + $0x450] sm:$0xff]  ;;  %v811_v44 = vld [vmem:[#allocation8 + $0x220] sm:$0xff] }
 0x1ce   : > { %2401 = vmatprep.subr.bf16.mxu1 %v2400_v3  ;;  %v1250_v3 = vld [vmem:[#allocation10 + $0x1d8] sm:$0xff]  ;;  %v884_v57 = vld [vmem:[#allocation8 + $0x468] sm:$0xff] }
 0x1cf   : > { %2507 = vmatpush1.bf16.msra.mxu0 %v2506_v8  ;;  %v2536_v7 = vpack.c.bf16 %v1250_v3, %v1248_v63  ;;  %v1247_v8 = vld [vmem:[#allocation10 + $0x1c0] sm:$0xff]  ;;  %v1281_v63 = vld [vmem:[#allocation10 + $0x2d0] sm:$0xff] }
 0x1d0   : > { %2509 = vmatprep.subr.bf16.mxu0 %v2508_v12  ;;  %v1254_v12 = vld [vmem:[#allocation10 + $0x1f8] sm:$0xff]  ;;  %v2538_v13 = vpack.c.bf16 %v1249_v10, %v1247_v8  ;;  %v796_v8 = vld [vmem:[#allocation8 + $0x1a8] sm:$0xff] }
 0x1d1   : > { %2403 = vmatpush1.bf16.msra.mxu1 %v2402_v17  ;;  %v2540_v14 = vpack.c.bf16 %v1254_v12, %v1252_v11  ;;  %v1256_v17 = vld [vmem:[#allocation10 + $0x208] sm:$0xff]  ;;  %v1286_v12 = vld [vmem:[#allocation10 + $0x2f8] sm:$0xff] }
 0x1d2   : > { %2405 = vmatprep.subr.bf16.mxu1 %v2404_v18  ;;  %v1258_v18 = vld [vmem:[#allocation10 + $0x218] sm:$0xff]  ;;  %v1284_v11 = vld [vmem:[#allocation10 + $0x2e8] sm:$0xff] }
 0x1d3   : > { %2511 = vmatpush1.bf16.msra.mxu0 %v2510_v21  ;;  %v2544_v20 = vpack.c.bf16 %v1258_v18, %v1256_v17  ;;  %v1255_v21 = vld [vmem:[#allocation10 + $0x200] sm:$0xff]  ;;  %v2572_v16 = vpack.c.bf16 %v1286_v12, %v1284_v11 }
 0x1d4   : > { %2513 = vmatprep.subr.bf16.mxu0 %v2512_v24  ;;  %v1262_v24 = vld [vmem:[#allocation10 + $0x238] sm:$0xff]  ;;  %v2546_v25 = vpack.c.bf16 %v1257_v22, %v1255_v21  ;;  %v745_v22 = vld [vmem:[#allocation8 + $0x10] sm:$0xff] }
 0x1d5   : > { %2407 = vmatpush1.bf16.msra.mxu1 %v2406_v29  ;;  %v2548_v26 = vpack.c.bf16 %v1262_v24, %v1260_v23  ;;  %v1264_v29 = vld [vmem:[#allocation10 + $0x248] sm:$0xff] }
 0x1d6   : > { %2409 = vmatprep.subr.bf16.mxu1 %v2408_v30  ;;  %v1266_v30 = vld [vmem:[#allocation10 + $0x258] sm:$0xff]  ;;  %v748_v23 = vld [vmem:[#allocation8 + $0x28] sm:$0xff] }
 0x1d7   : > { %2515 = vmatpush1.bf16.msra.mxu0 %v2514_v33  ;;  %v2552_v32 = vpack.c.bf16 %v1266_v30, %v1264_v29  ;;  %v1263_v33 = vld [vmem:[#allocation10 + $0x240] sm:$0xff]  ;;  %v2418_v29 = vpack.c.bf16 %v748_v23, %v745_v22  ;;  %v850_v23 = vld [vmem:[#allocation8 + $0x358] sm:$0xff] }
 0x1d8   : > { %2517 = vmatprep.subr.bf16.mxu0 %v2516_v34  ;;  %v1265_v34 = vld [vmem:[#allocation10 + $0x250] sm:$0xff]  ;;  %v847_v22 = vld [vmem:[#allocation8 + $0x340] sm:$0xff] }
 0x1d9   : > { %2411 = vmatpush1.bf16.msra.mxu1 %v2410_v2  ;;  %v2554_v37 = vpack.c.bf16 %v1265_v34, %v1263_v33  ;;  %v1267_v2 = vld [vmem:[#allocation10 + $0x260] sm:$0xff]  ;;  %v754_v34 = vld [vmem:[#allocation8 + $0x58] sm:$0xff] }
 0x1da   : > { %v751_v33 = vld [vmem:[#allocation8 + $0x40] sm:$0xff] }
 0x1db   : > { %2519 = vmatpush1.bf16.msra.mxu0 %v2518_v39  ;;  %v1269_v39 = vld [vmem:[#allocation10 + $0x270] sm:$0xff] }
 0x1dc   : > { %2521 = vmatprep.subr.bf16.mxu0 %v2520_v40  ;;  %v1272_v40 = vld [vmem:[#allocation10 + $0x288] sm:$0xff] }
 0x1dd   : > { %v2560_v42 = vpack.c.bf16 %v1274_v41, %v1272_v40 }
 0x1df   : > { %2523 = vmatpush1.bf16.msra.mxu0 %v2522_v45  ;;  %v1276_v45 = vld [vmem:[#allocation10 + $0x2a8] sm:$0xff] }
 0x1e0   : > { %2525 = vmatprep.subr.bf16.mxu0 %v2524_v9  ;;  %v1278_v9 = vld [vmem:[#allocation10 + $0x2b8] sm:$0xff] }
 0x1e1   : > { %v2564_v47 = vpack.c.bf16 %v1278_v9, %v1276_v45  ;;  %v814_v45 = vld [vmem:[#allocation8 + $0x238] sm:$0xff] }
 0x1e3   : > { %2527 = vmatpush1.bf16.msra.mxu0 %v2526_v50  ;;  %v2566_v50 = vpack.c.bf16 %v1277_v49, %v1275_v48  ;;  %v817_v49 = vld [vmem:[#allocation8 + $0x250] sm:$0xff] }
 0x1e4   : > { %2529 = vmatprep.subr.bf16.mxu0 %v2528_v51  ;;  %v882_v51 = vld [vmem:[#allocation8 + $0x458] sm:$0xff] }
 0x1e5   : > { %v2412_v54 = vpack.c.bf16 %v885_v52, %v882_v51  ;;  %v769_v52 = vld [vmem:[#allocation8 + $0xd0] sm:$0xff] }
 0x1e7   : > { %2531 = vmatpush1.bf16.msra.mxu0 %v2530_v58  ;;  %v1280_v58 = vld [vmem:[#allocation10 + $0x2c8] sm:$0xff]  ;;  %2413 = vmatprep.subr.bf16.mxu1 %v2412_v54 }
 0x1e8   : > { %2533 = vmatprep.subr.bf16.mxu0 %v2532_v59  ;;  %v2414_v59 = vpack.c.bf16 %v884_v57, %v881_v56  ;;  %v2568_v3 = vpack.c.bf16 %v1282_v60, %v1280_v58  ;;  %v772_v54 = vld [vmem:[#allocation8 + $0xe8] sm:$0xff]  ;;  %v823_v56 = vld [vmem:[#allocation8 + $0x280] sm:$0xff]  ;;  %v826_v57 = vld [vmem:[#allocation8 + $0x298] sm:$0xff] }
 0x1e9   : > { %v2436_v58 = vpack.c.bf16 %v826_v57, %v823_v56  ;;  %v778_v60 = vld [vmem:[#allocation8 + $0x118] sm:$0xff] }
 0x1ea   : > { %2415 = vmatpush1.bf16.msra.mxu1 %v2414_v59  ;;  %v775_v59 = vld [vmem:[#allocation8 + $0x100] sm:$0xff] }
 0x1eb   : > { %2535 = vmatpush1.bf16.msra.mxu0 %v2534_v6  ;;  %v2570_v6 = vpack.c.bf16 %v1281_v63, %v1279_v61  ;;  %v829_v61 = vld [vmem:[#allocation8 + $0x2b0] sm:$0xff]  ;;  %v2438_v63 = vpack.c.bf16 %v778_v60, %v775_v59 }
 0x1ec   : > { %2537 = vmatprep.subr.bf16.mxu0 %v2536_v7  ;;  %v793_v7 = vld [vmem:[#allocation8 + $0x190] sm:$0xff] }
 0x1ed   : > { %v2416_v10 = vpack.c.bf16 %v796_v8, %v793_v7  ;;  %v784_v7 = vld [vmem:[#allocation8 + $0x148] sm:$0xff]  ;;  %v835_v8 = vld [vmem:[#allocation8 + $0x2e0] sm:$0xff] }
 0x1ef   : > { %2539 = vmatpush1.bf16.msra.mxu0 %v2538_v13  ;;  %v1283_v13 = vld [vmem:[#allocation10 + $0x2e0] sm:$0xff]  ;;  %2417 = vmatprep.subr.bf16.mxu1 %v2416_v10  ;;  %v838_v10 = vld [vmem:[#allocation8 + $0x2f8] sm:$0xff] }
 0x1f0   : > { %2541 = vmatprep.subr.bf16.mxu0 %v2540_v14  ;;  %v1285_v14 = vld [vmem:[#allocation10 + $0x2f0] sm:$0xff]  ;;  %v2444_v12 = vpack.c.bf16 %v838_v10, %v835_v8 }
 0x1f1   : > { %v2574_v17 = vpack.c.bf16 %v1285_v14, %v1283_v13  ;;  %v787_v13 = vld [vmem:[#allocation8 + $0x160] sm:$0xff]  ;;  %v790_v14 = vld [vmem:[#allocation8 + $0x178] sm:$0xff] }
 0x1f3   : > { %2543 = vmatpush1.bf16.msra.mxu0 %v2542_v19 }
 0x1f4   : > { %2545 = vmatprep.subr.bf16.mxu0 %v2544_v20 }
 0x1f6   : > { %1352 = vmatmul.mubr.f32.vlgmr.msra.gmra.mrb[8].mxu0 %v3413_v4 }
 0x1f7   : > { %1357 = vmatprep.mubr.f32.mxu0 %v3438_v62  ;;  %2547 = vmatpush1.bf16.msra.mxu0 %v2546_v25  ;;  %v2558_v62 = vpack.c.bf16 %v1269_v39, %v1267_v2  ;;  %v2422_v39 = vpack.c.bf16 %v754_v34, %v751_v33  ;;  %v2788_v33 = vld [vmem:[%s3374_s12 + $0x8] sm:$0xff] }
 0x1f8   : > { %2549 = vmatprep.subr.bf16.mxu0 %v2548_v26  ;;  %v799_v26 = vld [vmem:[#allocation8 + $0x1c0] sm:$0xff] }
 0x1fa   : > { %1358 = vmatmul.mubr.f32.gmra.mrb[10].mxu0 %v3416_v5 }
 0x1fb   : > { %2551 = vmatpush1.bf16.msra.mxu0 %v2550_v31  ;;  %1428 = vmatprep.mubr.f32.mxu0 %v3061_v15 }
 0x1fc   : > { %2553 = vmatprep.subr.bf16.mxu0 %v2552_v32  ;;  %v2420_v32 = vpack.c.bf16 %v802_v27, %v799_v26  ;;  %v853_v26 = vld [vmem:[#allocation8 + $0x370] sm:$0xff]  ;;  %v856_v27 = vld [vmem:[#allocation8 + $0x388] sm:$0xff] }
 0x1ff   : > { %2555 = vmatpush1.bf16.msra.mxu0 %v2554_v37  ;;  %v808_v37 = vld [vmem:[#allocation8 + $0x208] sm:$0xff] }
 0x200   : > { %2557 = vmatprep.subr.bf16.mxu0 %v2556_v38  ;;  %v2424_v41 = vpack.c.bf16 %v808_v37, %v805_v36  ;;  %v868_v36 = vld [vmem:[#allocation8 + $0x3e8] sm:$0xff] }
 0x203   : > { %2559 = vmatpush1.bf16.msra.mxu0 %v2558_v62  ;;  %v760_v62 = vld [vmem:[#allocation8 + $0x88] sm:$0xff] }
 0x204   : > { %2561 = vmatprep.subr.bf16.mxu0 %v2560_v42 }
 0x207   : > { %2563 = vmatpush1.bf16.msra.mxu0 %v2562_v46  ;;  %v2428_v46 = vpack.c.bf16 %v814_v45, %v811_v44  ;;  %v1447_v44 = vlaneseq }
 0x208   : > { %2565 = vmatprep.subr.bf16.mxu0 %v2564_v47  ;;  %v766_v47 = vld [vmem:[#allocation8 + $0xb8] sm:$0xff] }
 0x209   : > { %v1448_v45 = vshrl.u32 %v1447_v44, 7 }
 0x20b   : > { %2567 = vmatpush1.bf16.msra.mxu0 %v2566_v50  ;;  %v820_v50 = vld [vmem:[#allocation8 + $0x268] sm:$0xff] }
 0x20c   : > { %2569 = vmatprep.subr.bf16.mxu0 %v2568_v3  ;;  %v2432_v51 = vpack.c.bf16 %v820_v50, %v817_v49 }
 0x20f   : > { %2571 = vmatpush1.bf16.msra.mxu0 %v2570_v6  ;;  %v781_v6 = vld [vmem:[#allocation8 + $0x130] sm:$0xff] }
 0x210   : > { %2573 = vmatprep.subr.bf16.mxu0 %v2572_v16  ;;  %v2442_v11 = vpack.c.bf16 %v784_v7, %v781_v6  ;;  %v844_v16 = vld [vmem:[#allocation8 + $0x328] sm:$0xff] }
 0x213   : > { %2575 = vmatpush1.bf16.msra.mxu0 %v2574_v17  ;;  %v2446_v17 = vpack.c.bf16 %v790_v14, %v787_v13 }
 0x289   : > { %v3452_v18 = vpop.f32.mrb[4].mxu0 }
 0x28a   : > { %v3454_v19 = vpop.f32.mrb[5].mxu0 }
 0x28d   : > { %v3456_v20 = vpop.f32.mrb[6].mxu0 }
 0x28e   : > { %v2205_v21 = vpop.f32.mrb[0].mxu1  ;;  %v3458_v24 = vpop.f32.mrb[7].mxu0 }
 0x28f   : > { %v576_v25 = vpop.f32.mrb[1].mxu1  ;;  %v586_v30 = vmul.f32 2.0, %v2205_v21 }
 0x290   : > { %v585_v28 = vmul.f32 2.0, %v576_v25  ;;  %v2452_v25 = vpack.c.bf16 %v850_v23, %v847_v22  ;;  %v3493_v23 = vld [vmem:[%s3382_s14] sm:$0xff] }
 0x291   : > { %v3465_v40 = vsub.f32 %v586_v30, %v3404_v1  ;;  %v763_v1 = vld [vmem:[#allocation8 + $0xa0] sm:$0xff] }
 0x292   : > { %v3461_v31 = vsub.f32 %v585_v28, %v3401_v0  ;;  %v757_v0 = vld [vmem:[#allocation8 + $0x70] sm:$0xff]  ;;  %v859_v30 = vld [vmem:[#allocation8 + $0x3a0] sm:$0xff] }
 0x293   : > { %v2219_v35 = vpop.f32.mrb[2].mxu1  ;;  %v2426_v9 = vpack.c.bf16 %v760_v62, %v757_v0  ;;  %v2787_v28 = vld [vmem:[%s3374_s12] sm:$0xff] }
 0x294   : > { %v730_v38 = vpop.f32.mrb[3].mxu1  ;;  %1029 = vmatmul.mubr.f32.vlgmr.msra.gmra.mrb[4].mxu1 %v3461_v31  ;;  %v740_v42 = vmul.f32 2.0, %v2219_v35  ;;  %v865_v35 = vld [vmem:[#allocation8 + $0x3d0] sm:$0xff]  ;;  %v883_v62 = vld [vmem:[#allocation8 + $0x460] sm:$0xff] }
 0x295   : > { %v739_v2 = vmul.f32 2.0, %v730_v38  ;;  %2419 = vmatpush3.bf16.msra.mxu1 %v2418_v29  ;;  %1034 = vmatprep.mubr.f32.mxu1 %v3061_v15  ;;  %v2456_v29 = vpack.c.bf16 %v856_v27, %v853_v26  ;;  %v2464_v37 = vpack.c.bf16 %v868_v36, %v865_v35  ;;  %v871_v38 = vld [vmem:[#allocation8 + $0x400] sm:$0xff]  ;;  %v3499_v26 = vld [vmem:[%s3382_s14 + $0x8] sm:$0xff] }
 0x296   : > { %2421 = vmatprep.subr.bf16.mxu1 %v2420_v32  ;;  %v742_v48 = vsub.f32 %v740_v42, %v3416_v5  ;;  %v832_v5 = vld [vmem:[#allocation8 + $0x2c8] sm:$0xff]  ;;  %v862_v32 = vld [vmem:[#allocation8 + $0x3b8] sm:$0xff] }
 0x297   : > { %v741_v43 = vsub.f32 %v739_v2, %v3413_v4  ;;  %v2430_v4 = vpack.c.bf16 %v766_v47, %v763_v1  ;;  %v2440_v3 = vpack.c.bf16 %v832_v5, %v829_v61  ;;  %v2460_v34 = vpack.c.bf16 %v862_v32, %v859_v30  ;;  %v874_v2 = vld [vmem:[#allocation8 + $0x418] sm:$0xff]  ;;  %v1657_v30 = vld [vmem:[#allocation11 + $0x80] sm:$0xff]  ;;  %v1658_v32 = vld [vmem:[#allocation11 + $0x88] sm:$0xff] }
 0x298   : > { %1035 = vmatmul.mubr.f32.gmra.mrb[6].mxu1 %v3465_v40  ;;  %v886_v42 = vld [vmem:[#allocation8 + $0x478] sm:$0xff]  ;;  %v2584_v36 = vpack.c.bf16 %v1658_v32, %v1657_v30  ;;  %v1677_v32 = vld [vmem:[#allocation11 + $0x120] sm:$0xff] }
 0x299   : > { %2423 = vmatpush3.bf16.msra.mxu1 %v2422_v39  ;;  %1429 = vmatmul.mubr.f32.vlgmr.msra.gmra.mrb[8].mxu0 %v741_v43  ;;  %v877_v39 = vld [vmem:[#allocation8 + $0x430] sm:$0xff] }
 0x29a   : > { %1105 = vmatprep.mubr.f32.mxu1 %v3432_v55  ;;  %2425 = vmatprep.subr.bf16.mxu1 %v2424_v41  ;;  %v2434_v55 = vpack.c.bf16 %v772_v54, %v769_v52  ;;  %v880_v41 = vld [vmem:[#allocation8 + $0x448] sm:$0xff]  ;;  %v2789_v43 = vld [vmem:[#allocation7] sm:$0xff] }
 0x29b   : > { %1434 = vmatprep.mubr.f32.mxu0 %v3061_v15  ;;  %v841_v15 = vld [vmem:[#allocation8 + $0x310] sm:$0xff]  ;;  %v2472_v0 = vpack.c.bf16 %v880_v41, %v877_v39 }
 0x29c   : > { %v2448_v21 = vpack.c.bf16 %v844_v16, %v841_v15 }
 0x29d   : > { %2427 = vmatpush3.bf16.msra.mxu1 %v2426_v9  ;;  %1435 = vmatmul.mubr.f32.gmra.mrb[10].mxu0 %v742_v48  ;;  %v1445_v9 = vld [vmem:[%s3583_s6] sm:$0x3]  ;;  %v1449_v48 = vsub.s32 0, %v1448_v45 }
 0x29e   : > { %2429 = vmatprep.subr.bf16.mxu1 %v2428_v46  ;;  %v1453_v46 = vsub.s32 1, %v1448_v45  ;;  %v1645_v45 = vld [vmem:[#allocation11 + $0x20] sm:$0xff] }
 0x2a0   : > { %v1454_v1 = vrot.slane %v1445_v9, %v1453_v46  ;;  %v1663_v46 = vld [vmem:[#allocation11 + $0xb0] sm:$0xff] }
 0x2a1   : > { %2431 = vmatpush3.bf16.msra.mxu1 %v2430_v4 }
 0x2a2   : > { %2433 = vmatprep.subr.bf16.mxu1 %v2432_v51 }
 0x2a5   : > { %2435 = vmatpush3.bf16.msra.mxu1 %v2434_v55 }
 0x2a6   : > { %2437 = vmatprep.subr.bf16.mxu1 %v2436_v58 }
 0x2a9   : > { %2439 = vmatpush3.bf16.msra.mxu1 %v2438_v63 }
 0x2aa   : > { %2441 = vmatprep.subr.bf16.mxu1 %v2440_v3 }
 0x2ad   : > { %2443 = vmatpush3.bf16.msra.mxu1 %v2442_v11 }
 0x2ae   : > { %2445 = vmatprep.subr.bf16.mxu1 %v2444_v12 }
 0x2b1   : > { %2447 = vmatpush3.bf16.msra.mxu1 %v2446_v17 }
 0x2b2   : > { %2449 = vmatprep.subr.bf16.mxu1 %v2448_v21 }
 0x2b4   : > { %1106 = vmatmul.mubr.f32.vlgmr.msra.gmra.mrb[8].mxu1 %v2787_v28 }
 0x2b5   : > { %1110 = vmatprep.mubr.f32.mxu1 %v3430_v53  ;;  %2451 = vmatpush3.bf16.msra.mxu1 %v2448_v21  ;;  %v2468_v53 = vpack.c.bf16 %v874_v2, %v871_v38  ;;  %v1642_v38 = vld [vmem:[#allocation11 + $0x8] sm:$0xff]  ;;  %v1659_v2 = vld [vmem:[#allocation11 + $0x90] sm:$0xff] }
 0x2b6   : > { %2453 = vmatprep.subr.bf16.mxu1 %v2452_v25 }
 0x2b8   : > { %1111 = vmatmul.mubr.f32.gmra.mrb[10].mxu1 %v2788_v33 }
 0x2b9   : > { %2455 = vmatpush3.bf16.msra.mxu1 %v2452_v25  ;;  %2252 = vmatprep.mubr.f32.mxu1 %v3461_v31  ;;  %v2476_v31 = vpack.c.bf16 %v886_v42, %v883_v62  ;;  %v1644_v62 = vld [vmem:[#allocation11 + $0x18] sm:$0xff]  ;;  %v1661_v42 = vld [vmem:[#allocation11 + $0xa0] sm:$0xff] }
 0x2ba   : > { %2457 = vmatprep.subr.bf16.mxu1 %v2456_v29 }
 0x2bd   : > { %2459 = vmatpush3.bf16.msra.mxu1 %v2456_v29  ;;  %v2792_v29 = vld [vmem:[#allocation7 + $0x8] sm:$0xff] }
 0x2be   : > { %2461 = vmatprep.subr.bf16.mxu1 %v2460_v34 }
 0x2c1   : > { %2463 = vmatpush3.bf16.msra.mxu1 %v2460_v34 }
 0x2c2   : > { %2465 = vmatprep.subr.bf16.mxu1 %v2464_v37 }
 0x2c5   : > { %2467 = vmatpush3.bf16.msra.mxu1 %v2464_v37  ;;  %v1641_v37 = vld [vmem:[#allocation11] sm:$0xff] }
 0x2c6   : > { %2469 = vmatprep.subr.bf16.mxu1 %v2468_v53  ;;  %v2586_v39 = vpack.c.bf16 %v1642_v38, %v1641_v37  ;;  %v1680_v37 = vld [vmem:[#allocation11 + $0x138] sm:$0xff] }
 0x2c9   : > { %2471 = vmatpush3.bf16.msra.mxu1 %v2468_v53  ;;  %v1660_v53 = vld [vmem:[#allocation11 + $0x98] sm:$0xff] }
 0x2ca   : > { %2473 = vmatprep.subr.bf16.mxu1 %v2472_v0  ;;  %v2588_v41 = vpack.c.bf16 %v1660_v53, %v1659_v2  ;;  %v1681_v2 = vld [vmem:[#allocation11 + $0x140] sm:$0xff]  ;;  %v1682_v53 = vld [vmem:[#allocation11 + $0x148] sm:$0xff] }
 0x2cd   : > { %2475 = vmatpush3.bf16.msra.mxu1 %v2472_v0  ;;  %v1643_v0 = vld [vmem:[#allocation11 + $0x10] sm:$0xff] }
 0x2ce   : > { %2477 = vmatprep.subr.bf16.mxu1 %v2476_v31 }
 0x2d1   : > { %2479 = vmatpush3.bf16.msra.mxu1 %v2476_v31  ;;  %v1662_v31 = vld [vmem:[#allocation11 + $0xa8] sm:$0xff] }
 0x2d2   : > { %v2592_v44 = vpack.c.bf16 %v1662_v31, %v1661_v42  ;;  %v1686_v42 = vld [vmem:[#allocation11 + $0x168] sm:$0xff] }
 0x2d4   : > { %2253 = vmatmul.mubr.f32.vlgmr.msra.gmra.mrb[12].mxu1 %v3465_v40  ;;  %v1450_v40 = vrot.slane %v1445_v9, %v1449_v48  ;;  %v1646_v9 = vld [vmem:[#allocation11 + $0x28] sm:$0xff] }
 0x2d5   : > { %2259 = vmatprep.mubr.msk.f32.mxu1 %vm428_vm0, %v2789_v43 }
 0x367   : > { %v1030_v47 = vpop.f32.mrb[4].mxu1 }
 0x368   : > { %v1031_v49 = vadd.f32 %v1030_v47, %v3452_v18  ;;  %v1032_v50 = vpop.f32.mrb[5].mxu1  ;;  %v2594_v47 = vpack.c.bf16 %v1646_v9, %v1645_v45 }
 0x369   : > { %v1033_v4 = vadd.f32 %v1032_v50, %v3454_v19  ;;  %v1648_v50 = vld [vmem:[#allocation11 + $0x38] sm:$0xff] }
 0x36b   : > { %v1036_v51 = vpop.f32.mrb[6].mxu1 }
 0x36c   : > { %v1037_v52 = vadd.f32 %v1036_v51, %v3456_v20  ;;  %v1430_v54 = vpop.f32.mrb[8].mxu0  ;;  %v1038_v56 = vpop.f32.mrb[7].mxu1  ;;  %v1666_v51 = vld [vmem:[#allocation11 + $0xc8] sm:$0xff] }
 0x36d   : > { %v2649_v57 = vadd.f32 %v1430_v54, %v1031_v49  ;;  %v1039_v55 = vadd.f32 %v1038_v56, %v3458_v24  ;;  %v1432_v58 = vpop.f32.mrb[9].mxu0  ;;  %v1647_v49 = vld [vmem:[#allocation11 + $0x30] sm:$0xff]  ;;  %v1649_v54 = vld [vmem:[#allocation11 + $0x40] sm:$0xff]  ;;  %v1650_v56 = vld [vmem:[#allocation11 + $0x48] sm:$0xff] }
 0x36e   : > { %v2651_v59 = vadd.f32 %v1432_v58, %v1033_v4  ;;  %v1665_v4 = vld [vmem:[#allocation11 + $0xc0] sm:$0xff]  ;;  %v2602_v58 = vpack.c.bf16 %v1650_v56, %v1649_v54 }
 0x36f   : > { %v1457_v60 = vadd.f32 %v2649_v57, %v1450_v40  ;;  %v1667_v57 = vld [vmem:[#allocation11 + $0xd0] sm:$0xff] }
 0x370   : > { %v3484_v61 = vadd.f32 %v2651_v59, %v1454_v1  ;;  %v1436_v5 = vpop.f32.mrb[10].mxu0 }
 0x371   : > { %v2039_v63 = vmul.f32 -1.442695, %v1457_v60  ;;  %v2653_v18 = vadd.f32 %v1436_v5, %v1037_v52  ;;  %v1438_v3 = vpop.f32.mrb[11].mxu0  ;;  %v2600_v52 = vpack.c.bf16 %v1666_v51, %v1665_v4  ;;  %v1651_v60 = vld [vmem:[#allocation11 + $0x50] sm:$0xff]  ;;  %v1652_v5 = vld [vmem:[#allocation11 + $0x58] sm:$0xff] }
 0x372   : > { %v2655_v6 = vadd.f32 %v1438_v3, %v1039_v55  ;;  %v1668_v55 = vld [vmem:[#allocation11 + $0xd8] sm:$0xff]  ;;  %v2606_v3 = vpack.c.bf16 %v1652_v5, %v1651_v60 }
 0x373   : > { %2767 = vpow2.f32 %v2039_v63  ;;  %v1459_v19 = vadd.f32 %v2653_v18, %v1450_v40  ;;  %v2598_v40 = vpack.c.bf16 %v1648_v50, %v1647_v49  ;;  %v2604_v59 = vpack.c.bf16 %v1668_v55, %v1667_v57  ;;  %v1669_v63 = vld [vmem:[#allocation11 + $0xe0] sm:$0xff]  ;;  %v1670_v18 = vld [vmem:[#allocation11 + $0xe8] sm:$0xff] }
 0x374   : > { %v3486_v7 = vadd.f32 %v2655_v6, %v1454_v1  ;;  %v1664_v1 = vld [vmem:[#allocation11 + $0xb8] sm:$0xff]  ;;  %v2608_v6 = vpack.c.bf16 %v1670_v18, %v1669_v63 }
 0x375   : > { %v2041_v20 = vmul.f32 -1.442695, %v1459_v19  ;;  %v2596_v48 = vpack.c.bf16 %v1664_v1, %v1663_v46  ;;  %v1653_v19 = vld [vmem:[#allocation11 + $0x60] sm:$0xff] }
 0x376   : > { %v2042_v55 = vmul.f32 -1.442695, %v3486_v7 }
 0x377   : > { %2769 = vpow2.f32 %v2041_v20  ;;  %v1654_v20 = vld [vmem:[#allocation11 + $0x68] sm:$0xff] }
 0x37d   : > { %v2768_v8 = vpop.eup %2767 }
 0x37e   : > { %v1473_v24 = vadd.f32 1.0, %v2768_v8  ;;  %v1671_v8 = vld [vmem:[#allocation11 + $0xf0] sm:$0xff] }
 0x380   : > { %2771 = vrcp.f32 %v1473_v24  ;;  %v1672_v24 = vld [vmem:[#allocation11 + $0xf8] sm:$0xff] }
 0x381   : > { %v2770_v10 = vpop.eup %2769 }
 0x382   : > { %v1475_v11 = vadd.f32 1.0, %v2770_v10  ;;  %v2610_v10 = vpack.c.bf16 %v1654_v20, %v1653_v19 }
 0x384   : > { %2773 = vrcp.f32 %v1475_v11  ;;  %v2612_v11 = vpack.c.bf16 %v1672_v24, %v1671_v8 }
 0x385   : > { %2775 = vpow2.f32 %v2042_v55 }
 0x387   : > { %v2104_v12 = vpop.f32.mrb[8].mxu1 }
 0x388   : > { %v2105_v13 = vpop.f32.mrb[9].mxu1 }
 0x389   : > { %v3488_v14 = vadd.f32 %v2105_v13, %v2104_v12  ;;  %v1655_v12 = vld [vmem:[#allocation11 + $0x70] sm:$0xff]  ;;  %v1656_v13 = vld [vmem:[#allocation11 + $0x78] sm:$0xff] }
 0x38a   : > { %v2772_v16 = vpop.eup %2771 }
 0x38b   : > { %v2107_v15 = vpop.f32.mrb[10].mxu1  ;;  %v3496_v25 = vmul.f32 %v3493_v23, %v2772_v16  ;;  %v1674_v16 = vld [vmem:[#allocation11 + $0x108] sm:$0xff] }
 0x38c   : > { %v2108_v17 = vpop.f32.mrb[11].mxu1 }
 0x38d   : > { %v3490_v21 = vadd.f32 %v2108_v17, %v2107_v15  ;;  %v1673_v15 = vld [vmem:[#allocation11 + $0x100] sm:$0xff]  ;;  %v2614_v17 = vpack.c.bf16 %v1656_v13, %v1655_v12 }
 0x38e   : > { %v2774_v22 = vpop.eup %2773 }
 0x38f   : > { %v3502_v27 = vmul.f32 %v3499_v26, %v2774_v22  ;;  %v2616_v22 = vpack.c.bf16 %v1674_v16, %v1673_v15 }
 0x391   : > { %v2576_v28 = vpack.c.bf16 %v3502_v27, %v3496_v25 }
 0x393   : > { %2577 = vmatprep.subr.bf16.mxu1 %v2576_v28 }
 0x394   : > { %2579 = vmatpush3.bf16.msra.mxu1 %v2576_v28  ;;  %v1675_v28 = vld [vmem:[#allocation11 + $0x110] sm:$0xff] }
 0x397   : > { %2260 = vmatmul.mubr.msk.f32.vlgmr.msra.gmra.mrb[14].mxu1 %vm428_vm0, %v2792_v29 }
 0x398   : > { %2266 = vmatprep.mubr.msk.f32.mxu1 %vm428_vm0, %v2789_v43  ;;  %v2590_v43 = vpack.c.bf16 %v1644_v62, %v1643_v0  ;;  %v1684_v0 = vld [vmem:[#allocation11 + $0x158] sm:$0xff]  ;;  %v1685_v62 = vld [vmem:[#allocation11 + $0x160] sm:$0xff] }
 0x399   : > { %v2640_v31 = vpack.c.bf16 %v1686_v42, %v1685_v62 }
 0x46a   : > { %v3508_v33 = vpop.f32.mrb[14].mxu1 }
 0x46b   : > { %v1553_v34 = vpop.f32.mrb[15].mxu1 }
 0x46c   : > { %v2580_v35 = vpack.c.bf16 %v3508_v33, %v1553_v34 }
 0x46e   : > { %2581 = vmatprep.subr.bf16.mxu1 %v2580_v35 }
 0x46f   : > { %2583 = vmatpush3.bf16.msra.mxu1 %v2580_v35 }
 0x470   : > { %2585 = vmatprep.subr.bf16.mxu1 %v2584_v36  ;;  %v1679_v36 = vld [vmem:[#allocation11 + $0x130] sm:$0xff] }
 0x471   : > { %v2628_v38 = vpack.c.bf16 %v1680_v37, %v1679_v36 }
 0x472   : > { %2267 = vmatmul.mubr.msk.f32.vlgmr.msra.gmra.mrb[16].mxu1 %vm428_vm0, %v2792_v29  ;;  %v1676_v29 = vld [vmem:[#allocation11 + $0x118] sm:$0xff] }
 0x473   : > { %2587 = vmatpush3.bf16.msra.mxu1 %v2586_v39  ;;  %1753 = vmatprep.mubr.f32.mxu1 %v1553_v34  ;;  %v2620_v30 = vpack.c.bf16 %v1676_v29, %v1675_v28  ;;  %v1678_v34 = vld [vmem:[#allocation11 + $0x128] sm:$0xff]  ;;  %v2632_v39 = vpack.c.bf16 %v1682_v53, %v1681_v2 }
 0x474   : > { %2589 = vmatprep.subr.bf16.mxu1 %v2588_v41  ;;  %v2624_v35 = vpack.c.bf16 %v1678_v34, %v1677_v32  ;;  %v1683_v41 = vld [vmem:[#allocation11 + $0x150] sm:$0xff] }
 0x477   : > { %2591 = vmatpush3.bf16.msra.mxu1 %v2590_v43  ;;  %v1687_v43 = vld [vmem:[#allocation11 + $0x170] sm:$0xff] }
 0x478   : > { %2593 = vmatprep.subr.bf16.mxu1 %v2592_v44  ;;  %v1688_v44 = vld [vmem:[#allocation11 + $0x178] sm:$0xff] }
 0x479   : > { %v2644_v45 = vpack.c.bf16 %v1688_v44, %v1687_v43 }
 0x47b   : > { %2595 = vmatpush3.bf16.msra.mxu1 %v2594_v47 }
 0x47c   : > { %2597 = vmatprep.subr.bf16.mxu1 %v2596_v48 }
 0x47f   : > { %2599 = vmatpush3.bf16.msra.mxu1 %v2598_v40 }
 0x480   : > { %2601 = vmatprep.subr.bf16.mxu1 %v2600_v52 }
 0x483   : > { %2603 = vmatpush3.bf16.msra.mxu1 %v2602_v58  ;;  %v2040_v58 = vmul.f32 -1.442695, %v3484_v61 }
 0x484   : > { %2605 = vmatprep.subr.bf16.mxu1 %v2604_v59 }
 0x485   : > { %2777 = vpow2.f32 %v2040_v58 }
 0x487   : > { %2607 = vmatpush3.bf16.msra.mxu1 %v2606_v3 }
 0x488   : > { %2609 = vmatprep.subr.bf16.mxu1 %v2608_v6 }
 0x48b   : > { %2611 = vmatpush3.bf16.msra.mxu1 %v2610_v10 }
 0x48c   : > { %2613 = vmatprep.subr.bf16.mxu1 %v2612_v11 }
 0x48f   : > { %2615 = vmatpush3.bf16.msra.mxu1 %v2614_v17 }
 0x490   : > { %2617 = vmatprep.subr.bf16.mxu1 %v2616_v22 }
 0x492   : > { %1754 = vmatmul.mubr.f32.vlgmr.msra.gmra.mrb[18].mxu1 %v3496_v25 }
 0x493   : > { %1758 = vmatprep.mubr.f32.mxu1 %v3508_v33  ;;  %2619 = vmatpush3.bf16.msra.mxu1 %v2616_v22  ;;  %v2636_v33 = vpack.c.bf16 %v1684_v0, %v1683_v41 }
 0x494   : > { %2621 = vmatprep.subr.bf16.mxu1 %v2620_v30 }
 0x496   : > { %1759 = vmatmul.mubr.f32.gmra.mrb[20].mxu1 %v3502_v27 }
 0x497   : > { %2623 = vmatpush3.bf16.msra.mxu1 %v2620_v30 }
 0x498   : > { %2625 = vmatprep.subr.bf16.mxu1 %v2624_v35 }
 0x49b   : > { %2627 = vmatpush3.bf16.msra.mxu1 %v2624_v35 }
 0x49c   : > { %2629 = vmatprep.subr.bf16.mxu1 %v2628_v38 }
 0x49f   : > { %2631 = vmatpush3.bf16.msra.mxu1 %v2628_v38 }
 0x4a0   : > { %2633 = vmatprep.subr.bf16.mxu1 %v2632_v39 }
 0x4a3   : > { %2635 = vmatpush3.bf16.msra.mxu1 %v2632_v39 }
 0x4a4   : > { %2637 = vmatprep.subr.bf16.mxu1 %v2636_v33 }
 0x4a7   : > { %2639 = vmatpush3.bf16.msra.mxu1 %v2636_v33 }
 0x4a8   : > { %2641 = vmatprep.subr.bf16.mxu1 %v2640_v31 }
 0x4ab   : > { %2643 = vmatpush3.bf16.msra.mxu1 %v2640_v31 }
 0x4ac   : > { %2645 = vmatprep.subr.bf16.mxu1 %v2644_v45 }
 0x4af   : > { %2647 = vmatpush3.bf16.msra.mxu1 %v2644_v45 }
 0x545   : > { %v2268_v9 = vpop.f32.mrb[16].mxu1 }
 0x546   : > { %v1638_v46 = vmul.f32 2.0, %v2268_v9  ;;  %v1628_v1 = vpop.f32.mrb[17].mxu1 }
 0x547   : > { %v1637_v47 = vmul.f32 2.0, %v1628_v1 }
 0x548   : > { %v1640_v49 = vsub.f32 %v1638_v46, %v3502_v27 }
 0x549   : > { %v1639_v48 = vsub.f32 %v1637_v47, %v3496_v25  ;;  %v2776_v25 = vpop.eup %2775 }
 0x54a   : > { %v2778_v27 = vpop.eup %2777  ;;  %v1476_v59 = vadd.f32 1.0, %v2776_v25 }
 0x54b   : > { %2301 = vmatprep.mubr.f32.mxu1 %v1639_v48  ;;  %v1474_v60 = vadd.f32 1.0, %v2778_v27 }
 0x54c   : > { %2302 = vmatmul.mubr.f32.vlgmr.msra.gmra.mrb[12].mxu1 %v1640_v49  ;;  %2779 = vrcp.f32 %v1476_v59 }
 0x54d   : > { %2781 = vrcp.f32 %v1474_v60 }
 0x556   : > { %v2780_v3 = vpop.eup %2779 }
 0x557   : > { %v2782_v6 = vpop.eup %2781  ;;  %v1855_v19 = vsub.f32 1.0, %v2780_v3  ;;  %v1853_v10 = vmul.f32 %v3499_v26, %v2780_v3 }
 0x558   : > { %v1854_v8 = vsub.f32 1.0, %v2782_v6  ;;  %v1852_v12 = vmul.f32 %v3493_v23, %v2782_v6 }
 0x565   : > { %v2168_v50 = vpop.f32.mrb[18].mxu1 }
 0x566   : > { %v2169_v4 = vpop.f32.mrb[19].mxu1 }
 0x567   : > { %v2170_v51 = vadd.f32 %v2169_v4, %v2168_v50 }
 0x569   : > { %v2171_v40 = vpop.f32.mrb[20].mxu1  ;;  %v2658_v52 = vadd.f32 %v2170_v51, %v3488_v14  ;;  %v2047_v14 = vld [vmem:[%s3584_s7] ss:$0 sm:$0xff] }
 0x56a   : > { %v2172_v54 = vpop.f32.mrb[21].mxu1 }
 0x56b   : > { %v2173_v56 = vadd.f32 %v2172_v54, %v2171_v40 }
 0x56d   : > { %v2656_v57 = vadd.f32 %v2173_v56, %v3490_v21 }
 0x61f   : > { %v2303_v5 = vpop.f32.mrb[12].mxu1 }
 0x620   : > { %v2657_v63 = vadd.f32 %v2656_v57, %v2303_v5  ;;  %v1830_v21 = vpop.f32.mrb[13].mxu1 }
 0x621   : > { %v2659_v7 = vadd.f32 %v2658_v52, %v1830_v21 }
 0x622   : > { %v1849_v18 = vadd.f32 %v2657_v63, %v2047_v14 }
 0x623   : > { %v1848_v61 = vadd.f32 %v2659_v7, %v2047_v14 }
 0x624   : > { %2783 = vtanh.f32 %v1849_v18 }
 0x625   : > { %2785 = vtanh.f32 %v1848_v61 }
 0x62e   : > { %v2784_v20 = vpop.eup %2783 }
 0x62f   : > { %v2786_v24 = vpop.eup %2785  ;;  %v1857_v11 = vmul.f32 %v2784_v20, %v1855_v19 }
 0x630   : > { %v1856_v13 = vmul.f32 %v2786_v24, %v1854_v8 }
 0x631   : > { %v1859_v15 = vadd.f32 %v1857_v11, %v1853_v10 }
 0x632   : > { %v1858_v16 = vadd.f32 %v1856_v13, %v1852_v12 }
 0x633   : > { %1861 = vst [vmem:[%s421_s25 + $0x8] sm:$0xff] %v1859_v15 }
 0x634   : > { %1860 = vst [vmem:[%s421_s25] sm:$0xff] %v1858_v16 }
 0x635   : > { %2978 = shalt.err (!%p2975_p8)
}
 0x636   : > { %s2979_s12 = scalar_lea.hbm %s3531_s18, 256  ;;  %s2983_s14 = scalar_lea.hbm %s3585_s8, 512 }
 0x637   : > { %p2980_p11 = scmp.ne.s32.totalorder %s3531_s18, %s2979_s12  ;;  %p2984_p1 = scmp.lt.u32.totalorder %s3531_s18, %s3585_s8 }
 0x638   : > { %p2985_p2 = scmp.lt.u32.totalorder %s2983_s14, %s2979_s12  ;;  %p2987_p0 = scmp.lt.u32.totalorder %s2979_s12, %s3531_s18 }
 0x639   : > { %p2981_p7 = pnand %p2980_p11, %p3272_p10 }
 0x63a   : > { %p2986_p13 = por %p2985_p2, %p2984_p1 }
 0x63b   : > { %p2982_p12 = pneg %p2981_p7 }
 0x63c   : > { %p2988_p4 = por %p2987_p0, %p2986_p13 }
 0x63e   : > { %p2989_p6 = pnand %p2988_p4, %p2982_p12 }
 0x640   : > { %2992 = shalt.err (!%p2989_p6)
}
 0x641   : > { %s3063_s10 = smov 128   ;;  %s3064_s23 = smov 8  }
 0x642   : > { %2686 = dma.vmem_to_hbm [thread:$0]  (%p3272_p10), %s3533_s5, 256, %s3531_s18, %s1863_s9, %s3063_s10, %s3063_s10, %s3064_s23  }
 0x643 PF: > { %s3622_s20 = sld [smem:[#allocation20_spill]]  ;;  %s1891_s25 = sand.u32 1, %s3035_s27  }
 0x644   : > { %p3624_p5 = scmp.ge.s32.totalorder %s3047_s30, 2  ;;  %s1892_s22 = scalar_lea.sflag [#allocation4], %s1891_s25 }
 0x649   : > { %p3623_p3 = scmp.ne.s32.totalorder %s3622_s20, 0 }
 0x64b   : > { %p2709_p9 = pnand %p3624_p5, %p3623_p3 }
 0x64d   : > { %3030 = dma.done.wait (!%p2709_p9), %s1892_s22, 256  }
 0x64e   : > { %3032 = vsyncadd (!%p2709_p9), %s1892_s22, 4294967040  ;;  %s3625_s4 = sld [smem:[#allocation21_spill]]  ;;  %p26_p8 = scmp.ge.s32.totalorder %s3262_s24, 4  }
 0x64f   : > { %s3626_s27 = smov %s3039_s28  ;;  %s3627_s28 = smov %s3043_s29 }
 0x650   : > { %s3629_s30 = smov %s3262_s24  ;;  %28 = sbr.rel (!%p26_p8) target bundleno = 14 (0xe), region = 126 }
 0x654   : > { %s3628_s29 = smov %s3625_s4 }
 0x657   :  { %1897 = vsyncpa [#allocation3], 1 }
 0x658   :  { %1899 = vsyncpa [#allocation3 + $0x1], 1 }
 0x659   :  { %1900 = vsyncpa [#allocation6], 1 }
 0x65a   :  { %1902 = vsyncpa [#allocation6 + $0x1], 1 }
 0x65b   :  { %1903 = vsyncpa [#allocation9], 1 }
 0x65c   :  { %1904 = vsyncpa [#allocation12], 1 }
 0x65d   :  { %1905 = vsyncpa [#allocation4], 1 }
 0x65e   :  { %1907 = vsyncpa [#allocation4 + $0x1], 1 }

</bundles_post_ra>
